<compile_context>
chip_gen: v6e
topology: v6e:2x2x1
jax: 0.10.0
libtpu: 0.0.40
codegen_flags: <defaults>
</compile_context>

<pallas_src>
import functools
import math

import jax
import jax.numpy as jnp
from jax.experimental import pallas as pl
from jax.experimental.pallas import tpu as pltpu

F32 = jnp.float32
BF16 = jnp.bfloat16
LANE = 128


def _round_up(v, m):
    return ((v + m - 1) // m) * m


def _vmem_limit_bytes():
    # Per-generation scoped-VMEM budget (~75% of physical), clamped to a sane
    # range; conservative 32 MiB fallback if the query is unavailable.
    try:
        cap = int(pltpu.get_tpu_info().vmem_capacity_bytes)
        return min(max(cap * 3 // 4, 32 * 1024 * 1024), 96 * 1024 * 1024)
    except Exception:
        return 32 * 1024 * 1024


def _pick_row_tile(np_):
    # np_ is a multiple of 128. Prefer >= 4 grid steps (so v7x's two
    # TensorCores each get >= 2 and the output writeback pipelines), with
    # MXU-friendly tile heights (multiples of 128/256).
    if np_ <= LANE:
        return np_
    for t in (512, 256, 128):
        if np_ % t == 0 and np_ // t >= 4:
            return t
    return 128 if np_ % 128 == 0 else np_


def _vmem_spec():
    return pl.BlockSpec(memory_space=pltpu.MemorySpace.VMEM)


# ----------------------------------------------------------------------------
# Kernel A (fused): k-hop ego network + fitness + node selection + S0 (+ S0^T,
# bf16 A) + x*fitness. Gridless, whole-array-in-VMEM (small/medium N).
# ----------------------------------------------------------------------------
def fused_select_kernel(x_ref, adj_ref, w_ref,
                        s0_ref, s0t_ref, adjbf_ref, masks_ref, xf_ref,
                        *, hop, act):
    n = adj_ref.shape[0]
    a = adj_ref[...]                                   # [N, N] f32 {0,1}
    a_bf = a.astype(BF16)
    adjbf_ref[...] = a_bf                              # bf16 copy for coarsening

    # --- k-hop ego network: OR(A^1 .. A^hop), self loops removed (bf16 MXU) ---
    reach = a_bf                                       # pattern of A^k
    acc = a_bf                                         # running OR, bf16 {0,1}
    for _ in range(hop - 1):                           # hop is a Python constant
        cnt = jnp.dot(reach, a_bf, preferred_element_type=jnp.float32)
        reach = (cnt > 0.0).astype(BF16)               # re-threshold every hop
        acc = jnp.maximum(acc, reach)

    offdiag = (jax.lax.broadcasted_iota(jnp.int32, (n, n), 0)
               != jax.lax.broadcasted_iota(jnp.int32, (n, n), 1))   # bool mask
    ego = jnp.where(offdiag, acc.astype(F32), 0.0)     # [N, N] f32, no self loops

    # --- fitness (stand-in MyScore): GCN-mean aggregation + self, activation ---
    x = x_ref[...]                                     # [N, H]
    s_col = jnp.sum(x * w_ref[...], axis=-1, keepdims=True)        # [N, 1] VPU
    s_row = jnp.transpose(s_col)                                   # [1, N] tiny
    deg = jnp.sum(ego, axis=1, keepdims=True)                      # [N, 1]
    agg = jnp.sum(ego * s_row, axis=1, keepdims=True) / jnp.maximum(deg, 1.0)
    fit_col = act(agg + s_col)                                     # [N, 1]
    fit_row = jnp.transpose(fit_col)                               # [1, N]

    # --- select_nodes(): column/row reductions, no N x N transposes ---
    a_nsl = jnp.where(offdiag, a, 0.0)                 # edges, self loops removed
    # node j is deleted iff exists edge i->j with fitness[j] < fitness[i]
    cmp = (fit_row < fit_col).astype(F32)              # cmp[i, j] = f[j] < f[i]
    del_row = jnp.max(a_nsl * cmp, axis=0, keepdims=True)                 # [1, N]
    src_row = jnp.transpose(jnp.max(a_nsl, axis=1, keepdims=True))        # [1, N]
    dst_row = jnp.max(a_nsl, axis=0, keepdims=True)                       # [1, N]
    selected_row = jnp.maximum(src_row, dst_row) * (1.0 - del_row)        # [1, N]

    # --- get_next(): ego edges into selected nodes, surplus nodes, S0 ---
    ego_del = ego * selected_row                       # keep edges whose dst selected
    all2_row = jnp.maximum(jnp.max(a, axis=0, keepdims=True),
                           jnp.transpose(jnp.max(a, axis=1, keepdims=True)))
    del2_row = jnp.maximum(jnp.max(ego_del, axis=0, keepdims=True),
                           jnp.transpose(jnp.max(ego_del, axis=1, keepdims=True)))
    surplus_row = all2_row * (1.0 - del2_row)                             # [1, N]
    keep_self_row = jnp.minimum(selected_row + surplus_row, 1.0)

    # S0: assignment matrix, columns still in ORIGINAL node ids ({0,1}).
    # Diagonal written via where (no dense eye materialization).
    s0 = jnp.where(offdiag, ego_del, keep_self_row)
    s0_ref[...] = s0.astype(BF16)                      # exact for {0,1}
    s0t_ref[...] = jnp.transpose(s0).astype(BF16)      # one-time transpose,
    #                                                    amortized over coarsening
    masks_ref[...] = jnp.concatenate([selected_row, surplus_row], axis=0)  # [2, N]
    xf_ref[...] = x * fit_col                          # [N, H] = x * fitness


# ----------------------------------------------------------------------------
# Kernel B: coarsening  M = (S0^T A S0 > 0), gridded over OUTPUT ROW tiles.
#   M[rows, :] = ((S0^T[rows, :] @ A) > 0) @ S0  > 0
# A and S0 are grid-invariant bf16 residents (Buffered(1)); the only streamed
# input is the S0^T row tile. Output rows are lane-dense and written as bf16.
# The permutation to compact ids is applied as gathers in the wrapper.
# ----------------------------------------------------------------------------
def coarsen_kernel(adj_ref, s0_ref, s0t_tile_ref, m_ref):
    c = jnp.dot(s0t_tile_ref[...], adj_ref[...],
                preferred_element_type=jnp.float32)            # [tm, N]
    c_bin = (c > 0.0).astype(BF16)                             # binarize (>0 pattern)
    m = jnp.dot(c_bin, s0_ref[...],
                preferred_element_type=jnp.float32)            # [tm, N]
    m_ref[...] = (m > 0.0).astype(BF16)


# ----------------------------------------------------------------------------
# Wrapper (plain-JAX glue: padding, node ordering / compaction via gathers)
# ----------------------------------------------------------------------------
def pooling_forward(x, adj, batch, w, *, ego_range=2, activation=jnp.tanh):
    N, H = x.shape
    Np = max(_round_up(N, LANE), LANE)
    Hp = max(_round_up(H, LANE), LANE)

    # Pad once: padded nodes have no edges and zero features -> they are
    # neither selected nor surplus and never perturb real-node results.
    x_p = jnp.zeros((Np, Hp), F32).at[:N, :H].set(x.astype(F32))
    adj_p = jnp.zeros((Np, Np), F32).at[:N, :N].set(adj.astype(F32))
    batch_p = jnp.zeros((Np,), jnp.int32).at[:N].set(batch.astype(jnp.int32))
    w_row = jnp.zeros((1, Hp), F32).at[0, :H].set(w.reshape(-1).astype(F32))

    vmem_limit = _vmem_limit_bytes()

    s0_bf, s0t_bf, adj_bf, masks, xf = pl.pallas_call(
        functools.partial(fused_select_kernel, hop=ego_range, act=activation),
        out_shape=(jax.ShapeDtypeStruct((Np, Np), BF16),   # S0 (original ids)
                   jax.ShapeDtypeStruct((Np, Np), BF16),   # S0^T
                   jax.ShapeDtypeStruct((Np, Np), BF16),   # A in bf16
                   jax.ShapeDtypeStruct((2, Np), F32),     # [selected; surplus]
                   jax.ShapeDtypeStruct((Np, Hp), F32)),   # x * fitness
        in_specs=[_vmem_spec()] * 3,
        out_specs=(_vmem_spec(),) * 5,
        compiler_params=pltpu.CompilerParams(vmem_limit_bytes=vmem_limit),
    )(x_p, adj_p, w_row)

    # Coarsening in original node ids, row-tiled (parallel across TCs on v7x).
    tm = _pick_row_tile(Np)
    grid = (Np // tm,)
    m_bf = pl.pallas_call(
        coarsen_kernel,
        out_shape=jax.ShapeDtypeStruct((Np, Np), BF16),
        grid=grid,
        in_specs=[pl.BlockSpec((Np, Np), lambda i: (0, 0),
                               pipeline_mode=pl.Buffered(1)),   # A bf16, resident
                  pl.BlockSpec((Np, Np), lambda i: (0, 0),
                               pipeline_mode=pl.Buffered(1)),   # S0 bf16, resident
                  pl.BlockSpec((tm, Np), lambda i: (i, 0))],    # S0^T row tile stream
        out_specs=pl.BlockSpec((tm, Np), lambda i: (i, 0)),
        compiler_params=pltpu.CompilerParams(
            dimension_semantics=("parallel",),
            vmem_limit_bytes=vmem_limit),
    )(adj_bf, s0_bf, s0t_bf)

    # Glue: next_nodes ordering (selected first, then surplus, each ascending,
    # matching torch.unique ordering), then apply the compaction as gathers —
    # no one-hot permutation matmuls.
    sel = masks[0] > 0.5
    sur = jnp.logical_and(masks[1] > 0.5, jnp.logical_not(sel))
    ids = jnp.arange(Np, dtype=jnp.int32)
    group = jnp.where(sel, 0, jnp.where(sur, 1, 2)).astype(jnp.int32)
    order = jnp.argsort(group * Np + ids)              # next_nodes (padded with dropped)
    next_num = jnp.sum((group < 2).astype(jnp.int32))
    valid = ids < next_num
    valid_f = valid.astype(F32)

    S = s0_bf[:, order].astype(F32) * valid_f[None, :]                      # [Np, Np]
    next_adj = (m_bf[order][:, order].astype(F32)
                * (valid_f[:, None] * valid_f[None, :]))                    # [Np, Np]
    next_x = xf[order] * valid_f[:, None]                                   # [Np, Hp]
    next_batch = jnp.where(valid, batch_p[order], 0)

    # Un-pad to the caller's sizes (next_num <= N, so no valid data is lost):
    # next_x: first next_num rows valid; next_adj: top-left next_num x next_num
    # block is the coarsened-graph pattern; S: first next_num columns valid.
    return (next_x[:N, :H], next_adj[:N, :N], S[:N, :N], next_batch[:N], next_num)


if __name__ == "__main__":
    N = 16          # num_nodes
    H = 32          # hidden_size
    EGO_RANGE = 2

    key = jax.random.PRNGKey(0)
    kx, ka, kw = jax.random.split(key, 3)

    x = jax.random.normal(kx, (N, H), dtype=F32)
    adj = (jax.random.uniform(ka, (N, N)) < 0.25).astype(F32)   # dense edge_index
    batch = jnp.zeros((N,), dtype=jnp.int32)

    # Deterministic MyScore parameter (hidden_size -> 1 scorer).
    w = jax.random.normal(kw, (H, 1), dtype=F32) * (1.0 / math.sqrt(H))

    next_x, next_adj, S, next_batch, next_num = pooling_forward(
        x, adj, batch, w, ego_range=EGO_RANGE, activation=jnp.tanh)

    jax.block_until_ready((next_x, next_adj, S, next_batch, next_num))
    print("KERNEL_OK")
</pallas_src>

<mosaic_0001>
module attributes {stable_mosaic.version = 11 : i64} {
  func.func @fused_select_kernel(%arg0: memref<128x128xf32, #tpu.memory_space<vmem>>, %arg1: memref<128x128xf32, #tpu.memory_space<vmem>>, %arg2: memref<1x128xf32, #tpu.memory_space<vmem>>, %arg3: memref<128x128xbf16, #tpu.memory_space<vmem>>, %arg4: memref<128x128xbf16, #tpu.memory_space<vmem>>, %arg5: memref<128x128xbf16, #tpu.memory_space<vmem>>, %arg6: memref<2x128xf32, #tpu.memory_space<vmem>>, %arg7: memref<128x128xf32, #tpu.memory_space<vmem>>) attributes {dimension_semantics = [], scalar_prefetch = 0 : i64, scratch_operands = 0 : i64, tpu.core_type = #tpu.core_type<tc>} {
    %c0 = arith.constant 0 : index
    %c0_0 = arith.constant 0 : index
    %0 = vector.load %arg1[%c0, %c0_0] : memref<128x128xf32, #tpu.memory_space<vmem>>, vector<128x128xf32>
    %1 = arith.truncf %0 : vector<128x128xf32> to vector<128x128xbf16>
    %c0_1 = arith.constant 0 : index
    %c0_2 = arith.constant 0 : index
    %2 = vector.load %arg5[%c0_1, %c0_2] : memref<128x128xbf16, #tpu.memory_space<vmem>>, vector<128x128xbf16>
    tpu.vector_store %arg5[%c0_1, %c0_2], %1 {strides = array<i32>} : memref<128x128xbf16, #tpu.memory_space<vmem>>, vector<128x128xbf16>,
    %cst = arith.constant dense<0.000000e+00> : vector<128x128xf32>
    %3 = tpu.matmul %1, %1, %cst {dimension_numbers = #tpu.dot_dimension_numbers<[1], [0], [0], [1], [0, 0, 1, 1], [], []>} : vector<128x128xbf16>, vector<128x128xbf16>, vector<128x128xf32> -> vector<128x128xf32>
    %cst_3 = arith.constant 0.000000e+00 : f32
    %4 = vector.broadcast %cst_3 : f32 to vector<128x128xf32>
    %5 = arith.cmpf ogt, %3, %4 : vector<128x128xf32>
    %6 = arith.extui %5 : vector<128x128xi1> to vector<128x128xi32>
    %7 = arith.sitofp %6 : vector<128x128xi32> to vector<128x128xf32>
    %8 = arith.truncf %7 : vector<128x128xf32> to vector<128x128xbf16>
    %9 = arith.maximumf %1, %8 : vector<128x128xbf16>
    %10 = tpu.iota {dimensions = array<i32: 0>} : vector<128x128xi32>
    %11 = tpu.iota {dimensions = array<i32: 1>} : vector<128x128xi32>
    %12 = arith.cmpi ne, %10, %11 : vector<128x128xi32>
    %13 = arith.extf %9 : vector<128x128xbf16> to vector<128x128xf32>
    %cst_4 = arith.constant 0.000000e+00 : f32
    %14 = vector.broadcast %cst_4 : f32 to vector<128x128xf32>
    %15 = arith.select %12, %13, %14 : vector<128x128xi1>, vector<128x128xf32>
    %c0_5 = arith.constant 0 : index
    %c0_6 = arith.constant 0 : index
    %16 = vector.load %arg0[%c0_5, %c0_6] : memref<128x128xf32, #tpu.memory_space<vmem>>, vector<128x128xf32>
    %c0_7 = arith.constant 0 : index
    %c0_8 = arith.constant 0 : index
    %17 = vector.load %arg2[%c0_7, %c0_8] : memref<1x128xf32, #tpu.memory_space<vmem>>, vector<1x128xf32>
    %18 = vector.broadcast %17 : vector<1x128xf32> to vector<128x128xf32>
    %19 = arith.mulf %16, %18 : vector<128x128xf32>
    %cst_9 = arith.constant dense<0.000000e+00> : vector<128xf32>
    %20 = vector.multi_reduction <add>, %19, %cst_9 [1] : vector<128x128xf32> to vector<128xf32>
    %21 = vector.shape_cast %20 : vector<128xf32> to vector<128x1xf32>
    %22 = tpu.transpose %21, [1, 0] : vector<128x1xf32> -> vector<1x128xf32>
    %cst_10 = arith.constant dense<0.000000e+00> : vector<128xf32>
    %23 = vector.multi_reduction <add>, %15, %cst_10 [1] : vector<128x128xf32> to vector<128xf32>
    %24 = vector.shape_cast %23 : vector<128xf32> to vector<128x1xf32>
    %25 = vector.broadcast %22 : vector<1x128xf32> to vector<128x128xf32>
    %26 = arith.mulf %15, %25 : vector<128x128xf32>
    %cst_11 = arith.constant dense<0.000000e+00> : vector<128xf32>
    %27 = vector.multi_reduction <add>, %26, %cst_11 [1] : vector<128x128xf32> to vector<128xf32>
    %28 = vector.shape_cast %27 : vector<128xf32> to vector<128x1xf32>
    %cst_12 = arith.constant 1.000000e+00 : f32
    %29 = vector.broadcast %cst_12 : f32 to vector<128x1xf32>
    %30 = arith.maximumf %24, %29 : vector<128x1xf32>
    %31 = arith.divf %28, %30 : vector<128x1xf32>
    %32 = arith.addf %31, %21 : vector<128x1xf32>
    %33 = math.tanh %32 : vector<128x1xf32>
    %34 = tpu.transpose %33, [1, 0] : vector<128x1xf32> -> vector<1x128xf32>
    %cst_13 = arith.constant 0.000000e+00 : f32
    %35 = vector.broadcast %cst_13 : f32 to vector<128x128xf32>
    %36 = arith.select %12, %0, %35 : vector<128x128xi1>, vector<128x128xf32>
    %37 = vector.broadcast %34 : vector<1x128xf32> to vector<128x128xf32>
    %38 = vector.broadcast %33 : vector<128x1xf32> to vector<128x128xf32>
    %39 = arith.cmpf olt, %37, %38 : vector<128x128xf32>
    %40 = arith.extui %39 : vector<128x128xi1> to vector<128x128xi32>
    %41 = arith.sitofp %40 : vector<128x128xi32> to vector<128x128xf32>
    %42 = arith.mulf %36, %41 : vector<128x128xf32>
    %cst_14 = arith.constant dense<0xFF800000> : vector<128xf32>
    %43 = vector.multi_reduction <maximumf>, %42, %cst_14 [0] : vector<128x128xf32> to vector<128xf32>
    %44 = vector.shape_cast %43 : vector<128xf32> to vector<1x128xf32>
    %cst_15 = arith.constant dense<0xFF800000> : vector<128xf32>
    %45 = vector.multi_reduction <maximumf>, %36, %cst_15 [1] : vector<128x128xf32> to vector<128xf32>
    %46 = vector.shape_cast %45 : vector<128xf32> to vector<128x1xf32>
    %47 = tpu.transpose %46, [1, 0] : vector<128x1xf32> -> vector<1x128xf32>
    %cst_16 = arith.constant dense<0xFF800000> : vector<128xf32>
    %48 = vector.multi_reduction <maximumf>, %36, %cst_16 [0] : vector<128x128xf32> to vector<128xf32>
    %49 = vector.shape_cast %48 : vector<128xf32> to vector<1x128xf32>
    %50 = arith.maximumf %47, %49 : vector<1x128xf32>
    %cst_17 = arith.constant 1.000000e+00 : f32
    %51 = vector.broadcast %cst_17 : f32 to vector<1x128xf32>
    %52 = arith.subf %51, %44 : vector<1x128xf32>
    %53 = arith.mulf %50, %52 : vector<1x128xf32>
    %54 = vector.broadcast %53 : vector<1x128xf32> to vector<128x128xf32>
    %55 = arith.mulf %15, %54 : vector<128x128xf32>
    %cst_18 = arith.constant dense<0xFF800000> : vector<128xf32>
    %56 = vector.multi_reduction <maximumf>, %0, %cst_18 [0] : vector<128x128xf32> to vector<128xf32>
    %57 = vector.shape_cast %56 : vector<128xf32> to vector<1x128xf32>
    %cst_19 = arith.constant dense<0xFF800000> : vector<128xf32>
    %58 = vector.multi_reduction <maximumf>, %0, %cst_19 [1] : vector<128x128xf32> to vector<128xf32>
    %59 = vector.shape_cast %58 : vector<128xf32> to vector<128x1xf32>
    %60 = tpu.transpose %59, [1, 0] : vector<128x1xf32> -> vector<1x128xf32>
    %61 = arith.maximumf %57, %60 : vector<1x128xf32>
    %cst_20 = arith.constant dense<0xFF800000> : vector<128xf32>
    %62 = vector.multi_reduction <maximumf>, %55, %cst_20 [0] : vector<128x128xf32> to vector<128xf32>
    %63 = vector.shape_cast %62 : vector<128xf32> to vector<1x128xf32>
    %cst_21 = arith.constant dense<0xFF800000> : vector<128xf32>
    %64 = vector.multi_reduction <maximumf>, %55, %cst_21 [1] : vector<128x128xf32> to vector<128xf32>
    %65 = vector.shape_cast %64 : vector<128xf32> to vector<128x1xf32>
    %66 = tpu.transpose %65, [1, 0] : vector<128x1xf32> -> vector<1x128xf32>
    %67 = arith.maximumf %63, %66 : vector<1x128xf32>
    %cst_22 = arith.constant 1.000000e+00 : f32
    %68 = vector.broadcast %cst_22 : f32 to vector<1x128xf32>
    %69 = arith.subf %68, %67 : vector<1x128xf32>
    %70 = arith.mulf %61, %69 : vector<1x128xf32>
    %71 = arith.addf %53, %70 : vector<1x128xf32>
    %cst_23 = arith.constant 1.000000e+00 : f32
    %72 = vector.broadcast %cst_23 : f32 to vector<1x128xf32>
    %73 = arith.minimumf %71, %72 : vector<1x128xf32>
    %74 = vector.shape_cast %73 : vector<1x128xf32> to vector<1x128xf32>
    %75 = vector.broadcast %74 : vector<1x128xf32> to vector<128x128xf32>
    %76 = arith.select %12, %55, %75 : vector<128x128xi1>, vector<128x128xf32>
    %77 = arith.truncf %76 : vector<128x128xf32> to vector<128x128xbf16>
    %c0_24 = arith.constant 0 : index
    %c0_25 = arith.constant 0 : index
    %78 = vector.load %arg3[%c0_24, %c0_25] : memref<128x128xbf16, #tpu.memory_space<vmem>>, vector<128x128xbf16>
    tpu.vector_store %arg3[%c0_24, %c0_25], %77 {strides = array<i32>} : memref<128x128xbf16, #tpu.memory_space<vmem>>, vector<128x128xbf16>,
    %79 = tpu.transpose %76, [1, 0] : vector<128x128xf32> -> vector<128x128xf32>
    %80 = arith.truncf %79 : vector<128x128xf32> to vector<128x128xbf16>
    %c0_26 = arith.constant 0 : index
    %c0_27 = arith.constant 0 : index
    %81 = vector.load %arg4[%c0_26, %c0_27] : memref<128x128xbf16, #tpu.memory_space<vmem>>, vector<128x128xbf16>
    tpu.vector_store %arg4[%c0_26, %c0_27], %80 {strides = array<i32>} : memref<128x128xbf16, #tpu.memory_space<vmem>>, vector<128x128xbf16>,
    %82 = tpu.concatenate %53, %70 in 0 : vector<1x128xf32>, vector<1x128xf32> -> vector<2x128xf32>
    %c0_28 = arith.constant 0 : index
    %c0_29 = arith.constant 0 : index
    %83 = vector.load %arg6[%c0_28, %c0_29] : memref<2x128xf32, #tpu.memory_space<vmem>>, vector<2x128xf32>
    tpu.vector_store %arg6[%c0_28, %c0_29], %82 {strides = array<i32>} : memref<2x128xf32, #tpu.memory_space<vmem>>, vector<2x128xf32>,
    %84 = vector.broadcast %33 : vector<128x1xf32> to vector<128x128xf32>
    %85 = arith.mulf %16, %84 : vector<128x128xf32>
    %c0_30 = arith.constant 0 : index
    %c0_31 = arith.constant 0 : index
    %86 = vector.load %arg7[%c0_30, %c0_31] : memref<128x128xf32, #tpu.memory_space<vmem>>, vector<128x128xf32>
    tpu.vector_store %arg7[%c0_30, %c0_31], %85 {strides = array<i32>} : memref<128x128xf32, #tpu.memory_space<vmem>>, vector<128x128xf32>,
    return
  }
}

</mosaic_0001>

<bundles_post_ra>
// kernel: tpu_custom_call.1
= control target key start
LH: loop header
LB: loop body
LE: loop exit
PB: predicated region body
PF: predicated region fallthrough
CT: control target
= control target key end

     0   :  { %13 = vsyncpa [#allocation3], 0  ;;  %s3092_s0 = inlined_call_operand.hbm [shape: f32[128,128], index: 0, kind: input, shape index: {}]   ;;  %s3093_s1 = inlined_call_operand.hbm [shape: f32[128,128], index: 1, kind: input, shape index: {}]   ;;  %s3094_s2 = inlined_call_operand.vmem [shape: f32[1,128], index: 2, kind: input, shape index: {}]   ;;  %s3095_s3 = inlined_call_operand.hbm [shape: bf16[128,128], index: 3, kind: output, shape index: {0}]   ;;  %s3096_s4 = inlined_call_operand.hbm [shape: bf16[128,128], index: 4, kind: output, shape index: {1}]   ;;  %s3097_s5 = inlined_call_operand.hbm [shape: bf16[128,128], index: 5, kind: output, shape index: {2}]   ;;  %s3098_s6 = inlined_call_operand.hbm [shape: f32[2,128], index: 6, kind: output, shape index: {3}]   ;;  %s3099_s7 = inlined_call_operand.hbm [shape: f32[128,128], index: 7, kind: output, shape index: {4}]  }
   0x1   :  { %14 = vsyncpa [#allocation6], 0 }
   0x2   :  { %15 = vsyncpa [#allocation4], 0 }
   0x3   :  { %16 = vsyncpa [#allocation9], 0 }
   0x4   :  { %17 = vsyncpa [#allocation12], 0  ;;  %s1969_s24 = smov [#allocation2]  }
   0x5   :  { %s23_s25 = sshll.u32 %s1969_s24, 4  ;;  %s24_s25 = int_to_ptr.vmem [resolvable:$true] %s23_s25 }
   0x6   :  { %s1827_s26 = scalar_lea.vmem %s24_s25, 2048  ;;  %p1832_p1 = scmp.lt.s32.totalorder %s24_s25, %s24_s25 }
   0x7   :  { %p1828_p0 = scmp.ne.s32.totalorder %s24_s25, %s1827_s26  ;;  %p1833_p2 = scmp.lt.s32.totalorder %s1827_s26, %s1827_s26 }
   0x9   :  { %p1834_p3 = por %p1833_p2, %p1832_p1 }
   0xb   :  { %p1835_p4 = pnand %p1834_p3, %p1828_p0 }
   0xd   :  { %1838 = shalt.err (!%p1835_p4)
}
   0xe   :  { %s1970_s27 = smov 128   ;;  %s1971_s28 = smov 8  }
   0xf   :  { %29 = dma.hbm_to_vmem [thread:$0]  %s3092_s0, 2048, %s24_s25, [#allocation3], %s1970_s27, %s1970_s27, %s1971_s28  }
  0x10   :  { %s1972_s8 = smov [#allocation5]  }
  0x11   :  { %s35_s9 = sshll.u32 %s1972_s8, 4  ;;  %s36_s9 = int_to_ptr.vmem [resolvable:$true] %s35_s9 }
  0x12   :  { %s1847_s10 = scalar_lea.vmem %s36_s9, 2048  ;;  %p1852_p6 = scmp.lt.s32.totalorder %s36_s9, %s36_s9 }
  0x13   :  { %p1848_p5 = scmp.ne.s32.totalorder %s36_s9, %s1847_s10  ;;  %p1853_p7 = scmp.lt.s32.totalorder %s1847_s10, %s1847_s10 }
  0x15   :  { %p1854_p8 = por %p1853_p7, %p1852_p6 }
  0x17   :  { %p1855_p9 = pnand %p1854_p8, %p1848_p5 }
  0x19   :  { %1858 = shalt.err (!%p1855_p9)
}
  0x1a   :  { %41 = dma.hbm_to_vmem [thread:$0]  %s3093_s1, 2048, %s36_s9, [#allocation6], %s1970_s27, %s1970_s27, %s1971_s28  }
  0x1b   :  { %1959 = dma.done.wait [#allocation3], 2048  }
  0x1c   :  { %1960 = vsyncadd [#allocation3], 4294965248 }
  0x1d   :  { %1961 = dma.done.wait [#allocation6], 2048  }
  0x1e   :  { %1962 = vsyncadd [#allocation6], 4294965248  ;;  %v2033_v0 = vld [vmem:[#allocation2] sm:$0xff]  ;;  %v2040_v2 = vld [vmem:[#allocation5 + $0x70] sm:$0xff]  ;;  %v308_v49 = vlaneseq  ;;  %s1974_s1 = smov [#allocation11]  }
  0x1f   :  { %3204 = vst [vmem:[#allocation19_spill] sm:$0xff] %v2033_v0  ;;  %v2038_v1 = vld [vmem:[%s3094_s2] ss:$0 sm:$0xff]  ;;  %3205 = vst [vmem:[#allocation20_spill] sm:$0xff] %v2040_v2  ;;  %v2044_v4 = vld [vmem:[#allocation5 + $0x78] sm:$0xff]  ;;  %s1355_s2 = sshll.u32 %s1974_s1, 4  ;;  %s1356_s2 = int_to_ptr.vmem [resolvable:$true] %s1355_s2 }
  0x20   :  { %v398_v3 = vmul.f32 %v2038_v1, %v2033_v0  ;;  %3206 = vst [vmem:[#allocation21_spill] sm:$0xff] %v2044_v4  ;;  %v2046_v5 = vld [vmem:[#allocation2 + $0x8] sm:$0xff]  ;;  %v2048_v6 = vld [vmem:[#allocation5 + $0x60] sm:$0xff]  ;;  %v2052_v7 = vpack.c.bf16 %v2044_v4, %v2040_v2  ;;  %v2056_v9 = vld [vmem:[#allocation2 + $0x10] sm:$0xff]  ;;  %v2187_v54 = vshrl.u32 %v308_v49, 7  ;;  %v2189_v55 = vand.u32 127, %v308_v49  ;;  %p1864_p11 = scmp.lt.s32.totalorder %s1356_s2, %s1356_s2 }
  0x21   :  { %3207 = vst [vmem:[#allocation22_spill] sm:$0xff] %v2046_v5  ;;  %3208 = vst [vmem:[#allocation23_spill] sm:$0xff] %v2048_v6  ;;  %v2054_v8 = vld [vmem:[#allocation5 + $0x68] sm:$0xff]  ;;  %v2058_v10 = vld [vmem:[#allocation5 + $0x50] sm:$0xff]  ;;  %v399_v11 = vmul.f32 %v2038_v1, %v2046_v5  ;;  %v400_v13 = vmul.f32 %v2038_v1, %v2056_v9  ;;  %s1859_s14 = scalar_lea.vmem %s1356_s2, 32 }
  0x22   :  { %3209 = vst [vmem:[#allocation24_spill] sm:$0xff] %v2054_v8  ;;  %3210 = vst [vmem:[#allocation25_spill] sm:$0xff] %v2056_v9  ;;  %414 = vadd.xlane.f32.xlu0 %v398_v3  ;;  %v2064_v12 = vpack.c.bf16 %v2054_v8, %v2048_v6  ;;  %v2068_v14 = vld [vmem:[#allocation5 + $0x58] sm:$0xff]  ;;  %v2072_v16 = vld [vmem:[#allocation5 + $0x40] sm:$0xff]  ;;  %1677 = vmatprep.subr.bf16.mxu0 %v2052_v7  ;;  %vm3203_vm0 = vcmp.ne.s32.totalorder %v2187_v54, %v2189_v55  ;;  %v2203_v59 = vadd.s32 8, %v2187_v54  ;;  %p1860_p10 = scmp.ne.s32.totalorder %s1356_s2, %s1859_s14  ;;  %p1865_p12 = scmp.lt.s32.totalorder %s1859_s14, %s1859_s14 }
  0x23   :  { %v2070_v15 = vld [vmem:[#allocation2 + $0x18] sm:$0xff]  ;;  %1646 = vst [vmem:[#allocation10 + $0x38] sm:$0xff] %v2052_v7   ;;  %1709 = vmatprep.subr.bf16.mxu1 %v2052_v7  ;;  %v2079_v17 = vpack.c.bf16 %v2068_v14, %v2058_v10  ;;  %v2081_v18 = vld [vmem:[#allocation5 + $0x48] sm:$0xff]  ;;  %v2083_v19 = vld [vmem:[#allocation2 + $0x20] sm:$0xff]  ;;  %1678 = vmatpush3.bf16.msra.mxu0 %v2052_v7  ;;  %v2220_v62 = vadd.s32 16, %v2187_v54 }
  0x24   :  { %3211 = vst [vmem:[#allocation26_spill] sm:$0xff] %v2070_v15  ;;  %3212 = vst [vmem:[#allocation27_spill] sm:$0xff] %v2083_v19  ;;  %v2085_v20 = vld [vmem:[#allocation5 + $0x30] sm:$0xff]  ;;  %1717 = vmatpush3.bf16.msra.mxu1 %v2052_v7  ;;  %v2092_v21 = vpack.c.bf16 %v2081_v18, %v2072_v16  ;;  %v2094_v22 = vld [vmem:[#allocation5 + $0x38] sm:$0xff]  ;;  %1679 = vmatprep.subr.bf16.mxu0 %v2064_v12  ;;  %v401_v27 = vmul.f32 %v2038_v1, %v2070_v15  ;;  %p1866_p13 = por %p1865_p12, %p1864_p11 }
  0x25   :  { %3213 = vst [vmem:[#allocation28_spill] sm:$0xff] %v2085_v20  ;;  %1645 = vst [vmem:[#allocation10 + $0x30] sm:$0xff] %v2064_v12   ;;  %v2096_v23 = vld [vmem:[#allocation5 + $0x20] sm:$0xff]  ;;  %1710 = vmatprep.subr.bf16.mxu1 %v2064_v12  ;;  %v2103_v24 = vpack.c.bf16 %v2094_v22, %v2085_v20  ;;  %v2105_v25 = vld [vmem:[#allocation5 + $0x28] sm:$0xff]  ;;  %418 = vadd.xlane.f32.xlu1 %v400_v13  ;;  %v402_v28 = vmul.f32 %v2038_v1, %v2083_v19 }
  0x26   :  { %1644 = vst [vmem:[#allocation10 + $0x28] sm:$0xff] %v2079_v17   ;;  %v2107_v26 = vld [vmem:[#allocation5 + $0x10] sm:$0xff]  ;;  %416 = vadd.xlane.f32.xlu0 %v399_v11  ;;  %1643 = vst [vmem:[#allocation10 + $0x20] sm:$0xff] %v2092_v21   ;;  %v2114_v29 = vld [vmem:[#allocation2 + $0x28] sm:$0xff]  ;;  %v2118_v30 = vpack.c.bf16 %v2105_v25, %v2096_v23  ;;  %1701 = vmatprep.mubr.bf16.mxu1 %v2092_v21  ;;  %vm3202_vm1 = vcmp.ne.s32.totalorder %v2203_v59, %v2189_v55  ;;  %v2248_v11 = vadd.s32 32, %v2187_v54  ;;  %p1867_p0 = pnand %p1866_p13, %p1860_p10 }
  0x27   :  { %3214 = vst [vmem:[#allocation29_spill] sm:$0xff] %v2114_v29  ;;  %v2120_v31 = vld [vmem:[#allocation5 + $0x18] sm:$0xff]  ;;  %1642 = vst [vmem:[#allocation10 + $0x18] sm:$0xff] %v2103_v24   ;;  %v2123_v32 = vld [vmem:[#allocation2 + $0x30] sm:$0xff]  ;;  %1680 = vmatpush3.bf16.msra.mxu0 %v2064_v12  ;;  %v403_v37 = vmul.f32 %v2038_v1, %v2114_v29  ;;  %vm3201_vm2 = vcmp.ne.s32.totalorder %v2220_v62, %v2189_v55 }
  0x28   :  { %3215 = vst [vmem:[#allocation30_spill] sm:$0xff] %v2123_v32  ;;  %v2127_v33 = vpack.c.bf16 %v2120_v31, %v2107_v26  ;;  %v2129_v34 = vld [vmem:[#allocation5] sm:$0xff]  ;;  %v2131_v35 = vld [vmem:[#allocation5 + $0x8] sm:$0xff]  ;;  %1718 = vmatpush3.bf16.msra.mxu1 %v2064_v12  ;;  %1641 = vst [vmem:[#allocation10 + $0x10] sm:$0xff] %v2118_v30   ;;  %1681 = vmatprep.subr.bf16.mxu0 %v2079_v17  ;;  %v404_v38 = vmul.f32 %v2038_v1, %v2123_v32  ;;  %v2243_v3 = vsel %vm3201_vm2, %v2107_v26, 0.0 }
  0x29   :  { %v2139_v36 = vpack.c.bf16 %v2131_v35, %v2129_v34  ;;  %1711 = vmatprep.subr.bf16.mxu1 %v2079_v17  ;;  %420 = vadd.xlane.f32.xlu1 %v401_v27  ;;  %v2149_v39 = vld [vmem:[#allocation2 + $0x40] sm:$0xff]  ;;  %v2151_v40 = vld [vmem:[#allocation2 + $0x38] sm:$0xff]  ;;  %v2162_v43 = vld [vmem:[#allocation2 + $0x50] sm:$0xff]  ;;  %3221 = vst [vmem:[#allocation36_spill] sm:$0xff] %v2187_v54  ;;  %v2213_v61 = vsel %vm3203_vm0, %v2129_v34, 0.0  ;;  %v2229_v63 = vsel %vm3202_vm1, %v2131_v35, 0.0  ;;  %vm3199_vm4 = vcmp.ne.s32.totalorder %v2248_v11, %v2189_v55 }
  0x2a   :  { %1640 = vst [vmem:[#allocation10 + $0x8] sm:$0xff] %v2127_v33   ;;  %422 = vadd.xlane.f32.xlu0 %v402_v28  ;;  %3216 = vst [vmem:[#allocation31_spill] sm:$0xff] %v2149_v39  ;;  %v406_v41 = vmul.f32 %v2038_v1, %v2149_v39  ;;  %v405_v42 = vmul.f32 %v2038_v1, %v2151_v40  ;;  %v2164_v44 = vld [vmem:[#allocation2 + $0x48] sm:$0xff]  ;;  %v408_v45 = vmul.f32 %v2038_v1, %v2162_v43  ;;  %v387_v47 = vld [vmem:[#allocation2 + $0x60] sm:$0xff] }
  0x2b   :  { %1524 = vst [vmem:[#allocation10] sm:$0xff] %v2139_v36   ;;  %3217 = vst [vmem:[#allocation32_spill] sm:$0xff] %v2151_v40  ;;  %1693 = vmatprep.mubr.bf16.mxu0 %v2139_v36  ;;  %1682 = vmatpush3.bf16.msra.mxu0 %v2079_v17  ;;  %v407_v46 = vmul.f32 %v2038_v1, %v2164_v44  ;;  %v2174_v48 = vld [vmem:[#allocation2 + $0x58] sm:$0xff]  ;;  %v410_v50 = vmul.f32 %v2038_v1, %v387_v47  ;;  %v389_v52 = vld [vmem:[#allocation2 + $0x70] sm:$0xff]  ;;  %v2262_v27 = vadd.s32 40, %v2187_v54 }
  0x2c   :  { %1719 = vmatpush3.bf16.msra.mxu1 %v2079_v17  ;;  %1683 = vmatprep.subr.bf16.mxu0 %v2092_v21  ;;  %3218 = vst [vmem:[#allocation33_spill] sm:$0xff] %v2162_v43  ;;  %3219 = vst [vmem:[#allocation34_spill] sm:$0xff] %v2164_v44  ;;  %v409_v51 = vmul.f32 %v2038_v1, %v2174_v48  ;;  %v2183_v53 = vld [vmem:[#allocation2 + $0x68] sm:$0xff]  ;;  %v412_v56 = vmul.f32 %v2038_v1, %v389_v52  ;;  %v2196_v58 = vld [vmem:[#allocation2 + $0x78] sm:$0xff]  ;;  %v2269_v28 = vsel %vm3199_vm4, %v2096_v23, 0.0 }
  0x2d   :  { %1712 = vmatprep.subr.bf16.mxu1 %v2092_v21  ;;  %424 = vadd.xlane.f32.xlu1 %v403_v37  ;;  %3220 = vst [vmem:[#allocation35_spill] sm:$0xff] %v2183_v53  ;;  %3222 = vst [vmem:[#allocation37_spill] sm:$0xff] %v2189_v55  ;;  %v411_v57 = vmul.f32 %v2038_v1, %v2183_v53  ;;  %v413_v60 = vmul.f32 %v2038_v1, %v2196_v58  ;;  %v2234_v1 = vadd.s32 24, %v2187_v54 }
  0x2e   :  { %426 = vadd.xlane.f32.xlu0 %v404_v38  ;;  %3223 = vst [vmem:[#allocation38_spill] sm:$0xff] %v2196_v58  ;;  %3224 = vst [vmem:[#allocation39_spill] sm:$0xff] %v2203_v59  ;;  %vm3158_vm5 = vcmp.ne.s32.totalorder %v2262_v27, %v2189_v55  ;;  %v2274_v37 = vadd.s32 48, %v2187_v54  ;;  %v2310_v47 = vadd.s32 72, %v2187_v54  ;;  %v2334_v52 = vadd.s32 88, %v2187_v54 }
  0x2f   :  { %1684 = vmatpush3.bf16.msra.mxu0 %v2092_v21  ;;  %3225 = vst [vmem:[#allocation40_spill] sm:$0xff] %v2213_v61  ;;  %3226 = vst [vmem:[#allocation41_spill] sm:$0xff] %v2220_v62  ;;  %vm3200_vm3 = vcmp.ne.s32.totalorder %v2234_v1, %v2189_v55  ;;  %v2281_v38 = vsel %vm3158_vm5, %v2105_v25, 0.0 }
  0x30   :  { %1720 = vmatpush3.bf16.msra.mxu1 %v2092_v21  ;;  %1685 = vmatprep.subr.bf16.mxu0 %v2103_v24  ;;  %3227 = vst [vmem:[#allocation42_spill] sm:$0xff] %v2229_v63  ;;  %3228 = vst [vmem:[#allocation43_spill] sm:$0xff] %v2234_v1  ;;  %v2255_v13 = vsel %vm3200_vm3, %v2120_v31, 0.0  ;;  %vm3198_vm6 = vcmp.ne.s32.totalorder %v2274_v37, %v2189_v55  ;;  %vm3195_vm9 = vcmp.ne.s32.totalorder %v2310_v47, %v2189_v55 }
  0x31   :  { %1713 = vmatprep.subr.bf16.mxu1 %v2103_v24  ;;  %428 = vadd.xlane.f32.xlu1 %v405_v42  ;;  %3229 = vst [vmem:[#allocation44_spill] sm:$0xff] %v2243_v3  ;;  %3230 = vst [vmem:[#allocation45_spill] sm:$0xff] %v2248_v11  ;;  %v2293_v42 = vsel %vm3198_vm6, %v2085_v20, 0.0  ;;  %vm3178_vm11 = vcmp.ne.s32.totalorder %v2334_v52, %v2189_v55 }
  0x32   :  { %430 = vadd.xlane.f32.xlu0 %v406_v41  ;;  %3231 = vst [vmem:[#allocation46_spill] sm:$0xff] %v2255_v13  ;;  %3232 = vst [vmem:[#allocation47_spill] sm:$0xff] %v2262_v27  ;;  %v2286_v41 = vadd.s32 56, %v2187_v54 }
  0x33   :  { %1686 = vmatpush3.bf16.msra.mxu0 %v2103_v24  ;;  %3233 = vst [vmem:[#allocation48_spill] sm:$0xff] %v2269_v28  ;;  %3234 = vst [vmem:[#allocation49_spill] sm:$0xff] %v2274_v37 }
  0x34   :  { %1721 = vmatpush3.bf16.msra.mxu1 %v2103_v24  ;;  %1687 = vmatprep.subr.bf16.mxu0 %v2118_v30  ;;  %3235 = vst [vmem:[#allocation50_spill] sm:$0xff] %v2281_v38  ;;  %3236 = vst [vmem:[#allocation51_spill] sm:$0xff] %v2286_v41  ;;  %vm3197_vm7 = vcmp.ne.s32.totalorder %v2286_v41, %v2189_v55 }
  0x35   :  { %1714 = vmatprep.subr.bf16.mxu1 %v2118_v30  ;;  %432 = vadd.xlane.f32.xlu1 %v407_v46  ;;  %3237 = vst [vmem:[#allocation52_spill] sm:$0xff] %v2293_v42  ;;  %v2305_v46 = vsel %vm3197_vm7, %v2094_v22, 0.0  ;;  %3240 = vst [vmem:[#allocation55_spill] sm:$0xff] %v2310_v47 }
  0x36   :  { %434 = vadd.xlane.f32.xlu0 %v408_v45  ;;  %v2298_v45 = vadd.s32 64, %v2187_v54  ;;  %3239 = vst [vmem:[#allocation54_spill] sm:$0xff] %v2305_v46  ;;  %3244 = vst [vmem:[#allocation59_spill] sm:$0xff] %v2334_v52 }
  0x37   :  { %1688 = vmatpush3.bf16.msra.mxu0 %v2118_v30 }
  0x38   :  { %1722 = vmatpush3.bf16.msra.mxu1 %v2118_v30  ;;  %1689 = vmatprep.subr.bf16.mxu0 %v2127_v33  ;;  %3238 = vst [vmem:[#allocation53_spill] sm:$0xff] %v2298_v45  ;;  %vm3196_vm8 = vcmp.ne.s32.totalorder %v2298_v45, %v2189_v55 }
  0x39   :  { %1715 = vmatprep.subr.bf16.mxu1 %v2127_v33  ;;  %436 = vadd.xlane.f32.xlu1 %v409_v51  ;;  %v2317_v49 = vsel %vm3196_vm8, %v2072_v16, 0.0  ;;  %v2329_v51 = vsel %vm3195_vm9, %v2081_v18, 0.0 }
  0x3a   :  { %438 = vadd.xlane.f32.xlu0 %v410_v50  ;;  %3241 = vst [vmem:[#allocation56_spill] sm:$0xff] %v2317_v49  ;;  %v2322_v50 = vadd.s32 80, %v2187_v54  ;;  %3243 = vst [vmem:[#allocation58_spill] sm:$0xff] %v2329_v51 }
  0x3b   :  { %1690 = vmatpush3.bf16.msra.mxu0 %v2127_v33 }
  0x3c   :  { %1723 = vmatpush3.bf16.msra.mxu1 %v2127_v33  ;;  %1691 = vmatprep.subr.bf16.mxu0 %v2139_v36  ;;  %3242 = vst [vmem:[#allocation57_spill] sm:$0xff] %v2322_v50  ;;  %vm3194_vm10 = vcmp.ne.s32.totalorder %v2322_v50, %v2189_v55 }
  0x3d   :  { %1716 = vmatprep.subr.bf16.mxu1 %v2139_v36  ;;  %440 = vadd.xlane.f32.xlu1 %v411_v57  ;;  %v2346_v57 = vadd.s32 96, %v2187_v54 }
  0x3e   :  { %442 = vadd.xlane.f32.xlu0 %v412_v56  ;;  %v2341_v56 = vsel %vm3194_vm10, %v2058_v10, 0.0 }
  0x3f   :  { %1692 = vmatpush3.bf16.msra.mxu0 %v2139_v36  ;;  %3245 = vst [vmem:[#allocation60_spill] sm:$0xff] %v2341_v56  ;;  %3246 = vst [vmem:[#allocation61_spill] sm:$0xff] %v2346_v57  ;;  %vm3149_vm12 = vcmp.ne.s32.totalorder %v2346_v57, %v2189_v55 }
  0x40   :  { %1724 = vmatpush3.bf16.msra.mxu1 %v2139_v36 }
  0x41   :  { %444 = vadd.xlane.f32.xlu1 %v413_v60  ;;  %v2353_v60 = vsel %vm3178_vm11, %v2068_v14, 0.0 }
  0x42   :  { %779 = vmax.xlane.f32.xlu0 %v2213_v61  ;;  %1694 = vmatmul.mubr.bf16.vlgmr.msra.gmra.mxu0 %v2127_v33  ;;  %3247 = vst [vmem:[#allocation62_spill] sm:$0xff] %v2353_v60 }
  0x43   :  { %1702 = vmatmul.mubr.bf16.vlgmr.msra.gmra.mxu1 %v2079_v17  ;;  %1697 = vmatprep.mubr.bf16.mxu0 %v2118_v30 }
  0x44   :  { %1705 = vmatprep.mubr.bf16.mxu1 %v2064_v12 }
  0x46   :  { %781 = vmax.xlane.f32.xlu0 %v2229_v63 }
  0x4a   :  { %783 = vmax.xlane.f32.xlu0 %v2243_v3  ;;  %1698 = vmatmul.mubr.bf16.gmra.mxu0 %v2103_v24 }
  0x4b   :  { %1706 = vmatmul.mubr.bf16.gmra.mxu1 %v2052_v7 }
  0x4e   :  { %785 = vmax.xlane.f32.xlu0 %v2255_v13 }
  0x52   :  { %787 = vmax.xlane.f32.xlu0 %v2269_v28 }
  0x56   :  { %789 = vmax.xlane.f32.xlu0 %v2281_v38 }
  0x5a   :  { %791 = vmax.xlane.f32.xlu0 %v2293_v42 }
  0x5e   :  { %793 = vmax.xlane.f32.xlu0 %v2305_v46 }
  0x62   :  { %795 = vmax.xlane.f32.xlu0 %v2317_v49  ;;  %v2365_v49 = vsel %vm3149_vm12, %v2048_v6, 0.0 }
  0x63   :  { %3249 = vst [vmem:[#allocation64_spill] sm:$0xff] %v2365_v49 }
  0x66   :  { %797 = vmax.xlane.f32.xlu0 %v2329_v51  ;;  %v2358_v51 = vadd.s32 104, %v2187_v54 }
  0x68   :  { %3248 = vst [vmem:[#allocation63_spill] sm:$0xff] %v2358_v51  ;;  %vm3148_vm13 = vcmp.ne.s32.totalorder %v2358_v51, %v2189_v55 }
  0x6a   :  { %799 = vmax.xlane.f32.xlu0 %v2341_v56  ;;  %v2374_v56 = vsel %vm3148_vm13, %v2054_v8, 0.0  ;;  %v2456_v8 = vadd.s32 120, %v2187_v54 }
  0x6b   :  { %3250 = vst [vmem:[#allocation65_spill] sm:$0xff] %v2374_v56 }
  0x6c   :  { %3267 = vst [vmem:[#allocation82_spill] sm:$0xff] %v2456_v8 }
  0x6e   :  { %801 = vmax.xlane.f32.xlu0 %v2353_v60 }
  0x72   :  { %803 = vmax.xlane.f32.xlu0 %v2365_v49 }
  0x76   :  { %805 = vmax.xlane.f32.xlu0 %v2374_v56 }
  0xab   :  { %v2377_v60 = vpop.xlane.xlu0 %414 }
  0xac   :  { %3251 = vst [vmem:[#allocation66_spill] sm:$0xff] %v2377_v60  ;;  %446 = vxpose.xlu0.b32.start [1/16] (narrow) %v2377_v60, 8 }
  0xae   :  { %v2382_v46 = vpop.xlane.xlu1 %418 }
  0xaf   :  { %v2380_v13 = vpop.xlane.xlu0 %416  ;;  %3253 = vst [vmem:[#allocation68_spill] sm:$0xff] %v2382_v46 }
  0xb0   :  { %3252 = vst [vmem:[#allocation67_spill] sm:$0xff] %v2380_v13  ;;  %447 = vxpose.xlu0.b32.cont [2/16] (narrow) %v2380_v13, 8 }
  0xb2   :  { %v2386_v49 = vpop.xlane.xlu1 %420 }
  0xb3   :  { %3254 = vst [vmem:[#allocation69_spill] sm:$0xff] %v2386_v49  ;;  %v2389_v3 = vpop.xlane.xlu0 %422 }
  0xb4   :  { %448 = vxpose.xlu0.b32.cont [3/16] (narrow) %v2382_v46, 8  ;;  %3255 = vst [vmem:[#allocation70_spill] sm:$0xff] %v2389_v3 }
  0xb6   :  { %v2392_v56 = vpop.xlane.xlu1 %424 }
  0xb7   :  { %3256 = vst [vmem:[#allocation71_spill] sm:$0xff] %v2392_v56  ;;  %v2395_v42 = vpop.xlane.xlu0 %426 }
  0xb8   :  { %449 = vxpose.xlu0.b32.cont [4/16] (narrow) %v2386_v49, 8  ;;  %3257 = vst [vmem:[#allocation72_spill] sm:$0xff] %v2395_v42 }
  0xba   :  { %v2400_v38 = vpop.xlane.xlu1 %428 }
  0xbb   :  { %v2398_v63 = vpop.xlane.xlu0 %430  ;;  %3259 = vst [vmem:[#allocation74_spill] sm:$0xff] %v2400_v38 }
  0xbc   :  { %450 = vxpose.xlu0.b32.cont [5/16] (narrow) %v2389_v3, 8  ;;  %3258 = vst [vmem:[#allocation73_spill] sm:$0xff] %v2398_v63 }
  0xbe   :  { %v2408_v58 = vpop.xlane.xlu1 %432 }
  0xbf   :  { %v2403_v61 = vpop.xlane.xlu0 %434  ;;  %3262 = vst [vmem:[#allocation77_spill] sm:$0xff] %v2408_v58 }
  0xc0   :  { %451 = vxpose.xlu0.b32.cont [6/16] (narrow) %v2392_v56, 8  ;;  %3260 = vst [vmem:[#allocation75_spill] sm:$0xff] %v2403_v61 }
  0xc2   :  { %v2416_v44 = vpop.xlane.xlu1 %436 }
  0xc3   :  { %v2406_v28 = vpop.xlane.xlu0 %438 }
  0xc4   :  { %452 = vxpose.xlu0.b32.cont [7/16] (narrow) %v2395_v42, 8  ;;  %3261 = vst [vmem:[#allocation76_spill] sm:$0xff] %v2406_v28 }
  0xc6   :  { %v2422_v40 = vpop.xlane.xlu1 %440 }
  0xc7   :  { %v2411_v53 = vpop.xlane.xlu0 %442  ;;  %3264 = vst [vmem:[#allocation79_spill] sm:$0xff] %v2422_v40 }
  0xc8   :  { %453 = vxpose.xlu0.b32.cont [8/16] (narrow) %v2400_v38, 8  ;;  %3263 = vst [vmem:[#allocation78_spill] sm:$0xff] %v2411_v53 }
  0xcb   :  { %v2414_v43 = vpop.xlane.xlu0 %779 }
  0xcc   :  { %454 = vxpose.xlu0.b32.cont [9/16] (narrow) %v2398_v63, 8 }
  0xcf   :  { %v2419_v39 = vpop.xlane.xlu0 %781 }
  0xd0   :  { %455 = vxpose.xlu0.b32.cont [10/16] (narrow) %v2408_v58, 8  ;;  %v2428_v58 = vpop.xlane.xlu1 %444 }
  0xd1   :  { %3265 = vst [vmem:[#allocation80_spill] sm:$0xff] %v2428_v58 }
  0xd3   :  { %v2425_v32 = vpop.xlane.xlu0 %783 }
  0xd4   :  { %456 = vxpose.xlu0.b32.cont [11/16] (narrow) %v2403_v61, 8 }
  0xd7   :  { %v2430_v61 = vpop.xlane.xlu0 %785 }
  0xd8   :  { %457 = vxpose.xlu0.b32.cont [12/16] (narrow) %v2416_v44, 8  ;;  %v3318_v41 = vld [vmem:[#allocation80_spill] sm:$0xff] }
  0xdb   :  { %v2433_v29 = vpop.xlane.xlu0 %787 }
  0xdc   :  { %458 = vxpose.xlu0.b32.cont [13/16] (narrow) %v2406_v28, 8 }
  0xdf   :  { %v2435_v63 = vpop.xlane.xlu0 %789 }
  0xe0   :  { %459 = vxpose.xlu0.b32.cont [14/16] (narrow) %v2422_v40, 8 }
  0xe3   :  { %v2437_v19 = vpop.xlane.xlu0 %791 }
  0xe4   :  { %460 = vxpose.xlu0.b32.cont [15/16] (narrow) %v2411_v53, 8 }
  0xe7   :  { %v2439_v28 = vpop.xlane.xlu0 %793 }
  0xe8   :  { %461 = vxpose.xlu0.b32.end [16/16] (narrow) %v2428_v58, 8  ;;  %v3160_v58 = vmov 0.0  }
  0xeb   :  { %v2441_v15 = vpop.xlane.xlu0 %795 }
  0xef   :  { %v2447_v13 = vpop.xlane.xlu0 %797 }
  0xf3   :  { %v2464_v6 = vpop.xlane.xlu0 %799 }
 0x102   :  { %v1695_v38 = vpop.f32.mrf.mxu0 }
 0x103   :  { %v1703_v40 = vpop.f32.mrf.mxu1  ;;  %vm246_vm14 = vcmp.gt.f32.partialorder %v1695_v38, 0.0  ;;  %v2450_v38 = vadd.s32 112, %v2187_v54 }
 0x104   :  { %v181_v42 = vpop.f32.mrf.mxu0  ;;  %vm254_vm15 = vcmp.gt.f32.partialorder %v1703_v40, 0.0  ;;  %v1409_v5 = vsel %vm246_vm14, 1.0, %v3160_v58 }
 0x105   :  { %v213_v53 = vpop.f32.mrf.mxu1  ;;  %v1417_v3 = vsel %vm254_vm15, 1.0, %v3160_v58  ;;  %3266 = vst [vmem:[#allocation81_spill] sm:$0xff] %v2450_v38  ;;  %vm3193_vm14 = vcmp.ne.s32.totalorder %v2450_v38, %v2189_v55  ;;  %v3317_v38 = vld [vmem:[#allocation78_spill] sm:$0xff] }
 0x106   :  { %v1696_v9 = vpop.f32.mrf.mxu0 }
 0x107   :  { %v1704_v56 = vpop.f32.mrf.mxu1  ;;  %vm247_vm13 = vcmp.gt.f32.partialorder %v1696_v9, 0.0 }
 0x108   :  { %vm255_vm12 = vcmp.gt.f32.partialorder %v1704_v56, 0.0  ;;  %v1410_v0 = vsel %vm247_vm13, 1.0, %v3160_v58  ;;  %v184_v60 = vpop.f32.mrf.mxu0  ;;  %vm244_vm13 = vcmp.gt.f32.partialorder %v181_v42, 0.0 }
 0x109   :  { %v1418_v49 = vsel %vm255_vm12, 1.0, %v3160_v58  ;;  %v293_v46 = vpack.c.bf16 %v1410_v0, %v1409_v5  ;;  %vm245_vm5 = vcmp.gt.f32.partialorder %v184_v60, 0.0  ;;  %v216_v42 = vpop.f32.mrf.mxu1  ;;  %vm3192_vm12 = vcmp.ne.s32.totalorder %v2456_v8, %v2189_v55 }
 0x10a   :  { %v297_v9 = vpack.c.bf16 %v1418_v49, %v1417_v3  ;;  %vm253_vm15 = vcmp.gt.f32.partialorder %v216_v42, 0.0 }
 0x10b   :  { %v301_v40 = vmax.bf16 %v293_v46, %v2127_v33  ;;  %v3268_v33 = vmov 0.0   ;;  %v2472_v46 = vsel %vm3193_vm14, %v2040_v2, 0.0  ;;  %v1707_v50 = vpop.f32.mrf.mxu1 }
 0x10c   :  { %v305_v0 = vmax.bf16 %v297_v9, %v2079_v17  ;;  %v1408_v3 = vsel %vm245_vm5, 1.0, %v3268_v33  ;;  %3269 = vst [vmem:[#allocation83_spill] sm:$0xff] %v2472_v46  ;;  %v1407_v17 = vsel %vm244_vm13, 1.0, %v3268_v33  ;;  %v1699_v9 = vpop.f32.mrf.mxu0  ;;  %vm252_vm5 = vcmp.gt.f32.partialorder %v213_v53, 0.0 }
 0x10d   :  { %v345_v56 = vunpack.c.l.bf16 %v301_v40  ;;  %v346_v58 = vunpack.c.h.bf16 %v301_v40  ;;  %v292_v49 = vpack.c.bf16 %v1408_v3, %v1407_v17  ;;  %v2490_v3 = vsel %vm3192_vm12, %v2044_v4, 0.0 }
 0x10e   :  { %v353_v40 = vunpack.c.l.bf16 %v305_v0  ;;  %3270 = vst [vmem:[#allocation84_spill] sm:$0xff] %v2490_v3  ;;  %v354_v1 = vunpack.c.h.bf16 %v305_v0  ;;  %v1415_v62 = vsel %vm252_vm5, 1.0, %v3268_v33  ;;  %v1416_v53 = vsel %vm253_vm15, 1.0, %v3268_v33  ;;  %v197_v42 = vpop.f32.mrf.mxu0 }
 0x10f   :  { %v2462_v5 = vsel %vm3201_vm2, %v345_v56, 0.0  ;;  %v2480_v60 = vsel %vm3200_vm3, %v346_v58, 0.0  ;;  %v2484_v56 = vpop.xlane.xlu0 %801  ;;  %v300_v17 = vmax.bf16 %v292_v49, %v2139_v36  ;;  %vm250_vm13 = vcmp.gt.f32.partialorder %v1699_v9, 0.0 }
 0x110   :  { %482 = vadd.xlane.f32.xlu1 %v2462_v5  ;;  %v2496_v58 = vsel %vm3194_vm10, %v353_v40, 0.0  ;;  %v2505_v36 = vsel %vm3178_vm11, %v354_v1, 0.0  ;;  %v1700_v0 = vpop.f32.mrf.mxu0  ;;  %v1413_v1 = vsel %vm250_vm13, 1.0, %v3268_v33  ;;  %v2528_v9 = vsub.s32 0, %v2187_v54 }
 0x111   :  { %v343_v40 = vunpack.c.l.bf16 %v300_v17  ;;  %vm251_vm5 = vcmp.gt.f32.partialorder %v1700_v0, 0.0  ;;  %vm258_vm15 = vcmp.gt.f32.partialorder %v1707_v50, 0.0 }
 0x112   :  { %v1414_v52 = vsel %vm251_vm5, 1.0, %v3268_v33  ;;  %v200_v50 = vpop.f32.mrf.mxu0  ;;  %vm248_vm5 = vcmp.gt.f32.partialorder %v197_v42, 0.0 }
 0x113   :  { %v2507_v49 = vpop.xlane.xlu0 %803  ;;  %v295_v20 = vpack.c.bf16 %v1414_v52, %v1413_v1 }
 0x114   :  { %484 = vadd.xlane.f32.xlu1 %v2480_v60 }
 0x115   :  { %807 = vmax.xlane.f32.xlu0 %v2472_v46  ;;  %v296_v46 = vpack.c.bf16 %v1416_v53, %v1415_v62  ;;  %v2514_v62 = vsel %vm3203_vm0, %v343_v40, 0.0  ;;  %v344_v53 = vunpack.c.h.bf16 %v300_v17  ;;  %v303_v40 = vmax.bf16 %v295_v20, %v2103_v24 }
 0x117   :  { %v304_v4 = vmax.bf16 %v296_v46, %v2092_v21  ;;  %v2519_v2 = vpop.xlane.xlu0 %805  ;;  %v2524_v21 = vsel %vm3202_vm1, %v344_v53, 0.0  ;;  %v1421_v53 = vsel %vm258_vm15, 1.0, %v3268_v33  ;;  %vm249_vm15 = vcmp.gt.f32.partialorder %v200_v50, 0.0 }
 0x118   :  { %498 = vadd.xlane.f32.xlu1 %v2496_v58  ;;  %v350_v45 = vunpack.c.h.bf16 %v303_v40 }
 0x119   :  { %809 = vmax.xlane.f32.xlu0 %v2490_v3  ;;  %v229_v3 = vpop.f32.mrf.mxu1  ;;  %v351_v46 = vunpack.c.l.bf16 %v304_v4  ;;  %v352_v1 = vunpack.c.h.bf16 %v304_v4  ;;  %v349_v4 = vunpack.c.l.bf16 %v303_v40 }
 0x11a   :  { %v2562_v42 = vsel %vm3197_vm7, %v350_v45, 0.0 }
 0x11b   :  { %v1708_v17 = vpop.f32.mrf.mxu1  ;;  %v2534_v52 = vsel %vm3196_vm8, %v351_v46, 0.0  ;;  %v2547_v46 = vsel %vm3195_vm9, %v352_v1, 0.0 }
 0x11c   :  { %500 = vadd.xlane.f32.xlu1 %v2505_v36  ;;  %vm259_vm13 = vcmp.gt.f32.partialorder %v1708_v17, 0.0 }
 0x11d   :  { %v1422_v54 = vsel %vm259_vm13, 1.0, %v3268_v33  ;;  %v232_v1 = vpop.f32.mrf.mxu1  ;;  %vm256_vm13 = vcmp.gt.f32.partialorder %v229_v3, 0.0 }
 0x11e   :  { %v299_v24 = vpack.c.bf16 %v1422_v54, %v1421_v53  ;;  %v1411_v54 = vsel %vm248_vm5, 1.0, %v3268_v33  ;;  %v1412_v53 = vsel %vm249_vm15, 1.0, %v3268_v33  ;;  %vm257_vm11 = vcmp.gt.f32.partialorder %v232_v1, 0.0 }
 0x11f   :  { %v294_v47 = vpack.c.bf16 %v1412_v53, %v1411_v54  ;;  %vm3274_vm5 = vcmp.ne.s32.totalorder %v2346_v57, %v2189_v55  ;;  %vm3275_vm15 = vcmp.ne.s32.totalorder %v2358_v51, %v2189_v55 }
 0x120   :  { %478 = vadd.xlane.f32.xlu1 %v2514_v62  ;;  %v307_v17 = vmax.bf16 %v299_v24, %v2052_v7  ;;  %v1419_v24 = vsel %vm256_vm13, 1.0, %v3268_v33 }
 0x121   :  { %v302_v40 = vmax.bf16 %v294_v47, %v2118_v30 }
 0x122   :  { %v357_v7 = vunpack.c.l.bf16 %v307_v17 }
 0x123   :  { %v347_v54 = vunpack.c.l.bf16 %v302_v40 }
 0x124   :  { %480 = vadd.xlane.f32.xlu1 %v2524_v21  ;;  %v2569_v50 = vsel %vm3193_vm14, %v357_v7, 0.0 }
 0x125   :  { %3271 = vst [vmem:[#allocation85_spill] sm:$0xff] %v2569_v50  ;;  %v2584_v47 = vsel %vm3199_vm4, %v347_v54, 0.0 }
 0x128   :  { %v462_v0 = vpop.trf.xlu0  ;;  %494 = vadd.xlane.f32.xlu1 %v2534_v52 }
 0x129   :  { %v2538_v59 = vrot.slane %v462_v0, %v2528_v9  ;;  %v2554_v0 = vsel %vm3198_vm6, %v349_v4, 0.0  ;;  %v1420_v4 = vsel %vm257_vm11, 1.0, %v3268_v33  ;;  %vm3273_vm11 = vcmp.ne.s32.totalorder %v2262_v27, %v2189_v55  ;;  %v3330_v27 = vld [vmem:[#allocation58_spill] sm:$0xff] }
 0x12a   :  { %v298_v45 = vpack.c.bf16 %v1420_v4, %v1419_v24 }
 0x12b   :  { %v525_v20 = vmul.f32 %v2538_v59, %v2505_v36  ;;  %v515_v24 = vmul.f32 %v2538_v59, %v2524_v21  ;;  %v516_v4 = vmul.f32 %v2538_v59, %v2462_v5  ;;  %v518_v54 = vmul.f32 %v2538_v59, %v2584_v47 }
 0x12c   :  { %496 = vadd.xlane.f32.xlu1 %v2547_v46  ;;  %v306_v30 = vmax.bf16 %v298_v45, %v2064_v12  ;;  %v517_v45 = vmul.f32 %v2538_v59, %v2480_v60 }
 0x12d   :  { %552 = vadd.xlane.f32.xlu0 %v525_v20  ;;  %v358_v20 = vunpack.c.h.bf16 %v307_v17  ;;  %v348_v17 = vunpack.c.h.bf16 %v302_v40 }
 0x12e   :  { %v355_v1 = vunpack.c.l.bf16 %v306_v30  ;;  %v356_v7 = vunpack.c.h.bf16 %v306_v30 }
 0x12f   :  { %v2577_v3 = vsel %vm3192_vm12, %v358_v20, 0.0  ;;  %v2590_v53 = vsel %vm3273_vm11, %v348_v17, 0.0  ;;  %v514_v20 = vmul.f32 %v2538_v59, %v2514_v62 }
 0x130   :  { %490 = vadd.xlane.f32.xlu1 %v2554_v0  ;;  %3272 = vst [vmem:[#allocation86_spill] sm:$0xff] %v2577_v3  ;;  %v2596_v12 = vsel %vm3274_vm5, %v355_v1, 0.0  ;;  %v2602_v40 = vsel %vm3275_vm15, %v356_v7, 0.0  ;;  %v519_v30 = vmul.f32 %v2538_v59, %v2590_v53 }
 0x131   :  { %3276 = vst [vmem:[#allocation87_spill] sm:$0xff] %v2602_v40 }
 0x134   :  { %492 = vadd.xlane.f32.xlu1 %v2562_v42 }
 0x138   :  { %506 = vadd.xlane.f32.xlu1 %v2569_v50 }
 0x13c   :  { %508 = vadd.xlane.f32.xlu1 %v2577_v3 }
 0x140   :  { %486 = vadd.xlane.f32.xlu1 %v2584_v47 }
 0x144   :  { %488 = vadd.xlane.f32.xlu1 %v2590_v53 }
 0x148   :  { %502 = vadd.xlane.f32.xlu1 %v2596_v12 }
 0x14c   :  { %504 = vadd.xlane.f32.xlu1 %v2602_v40 }
 0x150   :  { %530 = vadd.xlane.f32.xlu1 %v514_v20 }
 0x154   :  { %532 = vadd.xlane.f32.xlu1 %v515_v24 }
 0x158   :  { %534 = vadd.xlane.f32.xlu1 %v516_v4 }
 0x15a   :  { %811 = vxpose.xlu0.b32.start [1/16] (narrow) %v2414_v43, 8  ;;  %v520_v43 = vmul.f32 %v2538_v59, %v2554_v0 }
 0x15c   :  { %536 = vadd.xlane.f32.xlu1 %v517_v45 }
 0x15e   :  { %812 = vxpose.xlu0.b32.cont [2/16] (narrow) %v2419_v39, 8  ;;  %v521_v39 = vmul.f32 %v2538_v59, %v2562_v42 }
 0x160   :  { %538 = vadd.xlane.f32.xlu1 %v518_v54 }
 0x162   :  { %813 = vxpose.xlu0.b32.cont [3/16] (narrow) %v2425_v32, 8  ;;  %v522_v32 = vmul.f32 %v2538_v59, %v2534_v52 }
 0x164   :  { %540 = vadd.xlane.f32.xlu1 %v519_v30  ;;  %v3277_v30 = vld [vmem:[#allocation28_spill] sm:$0xff] }
 0x166   :  { %814 = vxpose.xlu0.b32.cont [4/16] (narrow) %v2430_v61, 8  ;;  %v523_v61 = vmul.f32 %v2538_v59, %v2547_v46 }
 0x168   :  { %542 = vadd.xlane.f32.xlu1 %v520_v43 }
 0x16a   :  { %815 = vxpose.xlu0.b32.cont [5/16] (narrow) %v2433_v29, 8  ;;  %v524_v29 = vmul.f32 %v2538_v59, %v2496_v58 }
 0x16c   :  { %544 = vadd.xlane.f32.xlu1 %v521_v39  ;;  %v3278_v39 = vld [vmem:[#allocation23_spill] sm:$0xff] }
 0x16e   :  { %816 = vxpose.xlu0.b32.cont [6/16] (narrow) %v2435_v63, 8 }
 0x170   :  { %546 = vadd.xlane.f32.xlu1 %v522_v32 }
 0x172   :  { %817 = vxpose.xlu0.b32.cont [7/16] (narrow) %v2437_v19, 8 }
 0x174   :  { %548 = vadd.xlane.f32.xlu1 %v523_v61 }
 0x176   :  { %818 = vxpose.xlu0.b32.cont [8/16] (narrow) %v2439_v28, 8 }
 0x178   :  { %550 = vadd.xlane.f32.xlu1 %v524_v29  ;;  %v3279_v29 = vld [vmem:[#allocation24_spill] sm:$0xff] }
 0x17a   :  { %819 = vxpose.xlu0.b32.cont [9/16] (narrow) %v2441_v15, 8 }
 0x17c   :  { %908 = vmax.xlane.f32.xlu1 %v2129_v34 }
 0x17e   :  { %820 = vxpose.xlu0.b32.cont [10/16] (narrow) %v2447_v13, 8 }
 0x180   :  { %910 = vmax.xlane.f32.xlu1 %v2131_v35 }
 0x182   :  { %821 = vxpose.xlu0.b32.cont [11/16] (narrow) %v2464_v6, 8 }
 0x184   :  { %912 = vmax.xlane.f32.xlu1 %v2107_v26 }
 0x186   :  { %822 = vxpose.xlu0.b32.cont [12/16] (narrow) %v2484_v56, 8 }
 0x188   :  { %914 = vmax.xlane.f32.xlu1 %v2120_v31 }
 0x18a   :  { %823 = vxpose.xlu0.b32.cont [13/16] (narrow) %v2507_v49, 8 }
 0x18c   :  { %916 = vmax.xlane.f32.xlu1 %v2096_v23 }
 0x18e   :  { %824 = vxpose.xlu0.b32.cont [14/16] (narrow) %v2519_v2, 8 }
 0x190   :  { %918 = vmax.xlane.f32.xlu1 %v2105_v25 }
 0x194   :  { %922 = vmax.xlane.f32.xlu1 %v2094_v22  ;;  %v526_v22 = vmul.f32 %v2538_v59, %v2596_v12 }
 0x198   :  { %924 = vmax.xlane.f32.xlu1 %v2072_v16 }
 0x199   :  { %v483_v15 = vpop.xlane.xlu1 %482 }
 0x19c   :  { %926 = vmax.xlane.f32.xlu1 %v2081_v18  ;;  %v527_v18 = vmul.f32 %v2538_v59, %v2602_v40 }
 0x19d   :  { %v485_v6 = vpop.xlane.xlu1 %484 }
 0x19e   :  { %v808_v19 = vpop.xlane.xlu0 %807  ;;  %v565_v32 = vmax.f32 %v485_v6, 1.0  ;;  %v3282_v6 = vld [vmem:[#allocation21_spill] sm:$0xff] }
 0x19f   :  { %825 = vxpose.xlu0.b32.cont [15/16] (narrow) %v808_v19, 8 }
 0x1a0   :  { %928 = vmax.xlane.f32.xlu1 %v2058_v10  ;;  %v528_v10 = vmul.f32 %v2538_v59, %v2569_v50 }
 0x1a1   :  { %v2651_v26 = vpop.xlane.xlu1 %498 }
 0x1a2   :  { %v810_v31 = vpop.xlane.xlu0 %809 }
 0x1a3   :  { %826 = vxpose.xlu0.b32.end [16/16] (narrow) %v810_v31, 8 }
 0x1a4   :  { %930 = vmax.xlane.f32.xlu1 %v2068_v14  ;;  %v529_v14 = vmul.f32 %v2538_v59, %v2577_v3 }
 0x1a5   :  { %v501_v2 = vpop.xlane.xlu1 %500 }
 0x1a6   :  { %v573_v23 = vmax.f32 %v501_v2, 1.0 }
 0x1a8   :  { %1737 = vrcp.f32 %v573_v23  ;;  %554 = vadd.xlane.f32.xlu1 %v526_v22  ;;  %v3280_v23 = vld [vmem:[#allocation20_spill] sm:$0xff]  ;;  %v3281_v22 = vld [vmem:[#allocation66_spill] sm:$0xff] }
 0x1a9   :  { %v479_v16 = vpop.xlane.xlu1 %478 }
 0x1aa   :  { %v562_v24 = vmax.f32 %v479_v16, 1.0 }
 0x1ac   :  { %556 = vadd.xlane.f32.xlu1 %v527_v18 }
 0x1ad   :  { %v481_v25 = vpop.xlane.xlu1 %480 }
 0x1ae   :  { %v563_v45 = vmax.f32 %v481_v25, 1.0 }
 0x1b0   :  { %558 = vadd.xlane.f32.xlu1 %v528_v10 }
 0x1b1   :  { %v2660_v34 = vpop.xlane.xlu1 %494 }
 0x1b4   :  { %560 = vadd.xlane.f32.xlu1 %v529_v14 }
 0x1b5   :  { %v1738_v35 = vpop.eup %1737  ;;  %v2664_v63 = vpop.xlane.xlu1 %496 }
 0x1b6   :  { %v553_v13 = vpop.xlane.xlu0 %552 }
 0x1b7   :  { %v601_v28 = vmul.f32 %v1738_v35, %v553_v13  ;;  %v3283_v35 = vld [vmem:[#allocation67_spill] sm:$0xff] }
 0x1b9   :  { %v621_v56 = vadd.f32 %v601_v28, %v2416_v44  ;;  %v491_v49 = vpop.xlane.xlu1 %490  ;;  %v564_v44 = vmax.f32 %v483_v15, 1.0 }
 0x1ba   :  { %v568_v14 = vmax.f32 %v491_v49, 1.0 }
 0x1bb   :  { %1739 = vtanh.f32 %v621_v56 }
 0x1bc   :  { %1741 = vrcp.f32 %v562_v24 }
 0x1bd   :  { %v493_v17 = vpop.xlane.xlu1 %492  ;;  %1743 = vrcp.f32 %v563_v45 }
 0x1be   :  { %1745 = vrcp.f32 %v564_v44 }
 0x1bf   :  { %1747 = vrcp.f32 %v565_v32  ;;  %v3285_v32 = vld [vmem:[#allocation69_spill] sm:$0xff] }
 0x1c1   :  { %v2667_v1 = vpop.xlane.xlu1 %506 }
 0x1c5   :  { %v2669_v7 = vpop.xlane.xlu1 %508 }
 0x1c8   :  { %v2671_v20 = vpop.eup %1739 }
 0x1c9   :  { %v1292_v59 = vmul.f32 %v2671_v20, %v2174_v48  ;;  %v487_v4 = vpop.xlane.xlu1 %486  ;;  %v1742_v19 = vpop.eup %1741 }
 0x1ca   :  { %v566_v48 = vmax.f32 %v487_v4, 1.0  ;;  %v1744_v18 = vpop.eup %1743  ;;  %v3284_v4 = vld [vmem:[#allocation68_spill] sm:$0xff] }
 0x1cb   :  { %1308 = vst [vmem:[#allocation13 + $0x58] sm:$0xff] %v1292_v59  ;;  %v1746_v28 = vpop.eup %1745  ;;  %v569_v59 = vmax.f32 %v493_v17, 1.0  ;;  %v571_v17 = vmax.f32 %v2664_v63, 1.0 }
 0x1cc   :  { %1749 = vrcp.f32 %v566_v48 }
 0x1cd   :  { %v489_v54 = vpop.xlane.xlu1 %488 }
 0x1ce   :  { %v567_v15 = vmax.f32 %v489_v54, 1.0  ;;  %v1748_v54 = vpop.eup %1747 }
 0x1d0   :  { %920 = vmax.xlane.f32.xlu0 %v3277_v30 }
 0x1d1   :  { %v2676_v43 = vpop.xlane.xlu1 %502 }
 0x1d4   :  { %932 = vmax.xlane.f32.xlu0 %v3278_v39  ;;  %v570_v39 = vmax.f32 %v2660_v34, 1.0 }
 0x1d5   :  { %v2679_v61 = vpop.xlane.xlu1 %504 }
 0x1d8   :  { %934 = vmax.xlane.f32.xlu0 %v3279_v29 }
 0x1d9   :  { %v531_v31 = vpop.xlane.xlu1 %530  ;;  %v1750_v29 = vpop.eup %1749 }
 0x1da   :  { %v579_v2 = vmul.f32 %v1742_v19, %v531_v31 }
 0x1dc   :  { %936 = vmax.xlane.f32.xlu0 %v3280_v23  ;;  %v610_v16 = vadd.f32 %v579_v2, %v3281_v22  ;;  %v3286_v2 = vld [vmem:[#allocation19_spill] sm:$0xff] }
 0x1dd   :  { %v533_v25 = vpop.xlane.xlu1 %532 }
 0x1de   :  { %1751 = vtanh.f32 %v610_v16  ;;  %v581_v10 = vmul.f32 %v1744_v18, %v533_v25 }
 0x1df   :  { %1753 = vrcp.f32 %v567_v15  ;;  %v3287_v15 = vld [vmem:[#allocation70_spill] sm:$0xff] }
 0x1e0   :  { %938 = vmax.xlane.f32.xlu0 %v3282_v6  ;;  %v611_v13 = vadd.f32 %v581_v10, %v3283_v35  ;;  %v572_v10 = vmax.f32 %v2651_v26, 1.0  ;;  %v3288_v6 = vld [vmem:[#allocation22_spill] sm:$0xff]  ;;  %v3291_v26 = vld [vmem:[#allocation72_spill] sm:$0xff] }
 0x1e1   :  { %v535_v56 = vpop.xlane.xlu1 %534 }
 0x1e2   :  { %1755 = vtanh.f32 %v611_v13  ;;  %v583_v24 = vmul.f32 %v1746_v28, %v535_v56 }
 0x1e3   :  { %1757 = vrcp.f32 %v568_v14  ;;  %v3289_v14 = vld [vmem:[#allocation71_spill] sm:$0xff] }
 0x1e4   :  { %v612_v45 = vadd.f32 %v583_v24, %v3284_v4 }
 0x1e5   :  { %v537_v30 = vpop.xlane.xlu1 %536 }
 0x1e6   :  { %1759 = vtanh.f32 %v612_v45  ;;  %v585_v44 = vmul.f32 %v1748_v54, %v537_v30 }
 0x1e7   :  { %1761 = vrcp.f32 %v569_v59  ;;  %v3290_v59 = vld [vmem:[#allocation25_spill] sm:$0xff] }
 0x1e8   :  { %v613_v49 = vadd.f32 %v585_v44, %v3285_v32  ;;  %v3292_v32 = vld [vmem:[#allocation26_spill] sm:$0xff] }
 0x1e9   :  { %v539_v48 = vpop.xlane.xlu1 %538 }
 0x1ea   :  { %1763 = vtanh.f32 %v613_v49  ;;  %v587_v19 = vmul.f32 %v1750_v29, %v539_v48  ;;  %v3293_v29 = vld [vmem:[#allocation74_spill] sm:$0xff] }
 0x1eb   :  { %v2689_v31 = vpop.eup %1751  ;;  %1765 = vrcp.f32 %v570_v39 }
 0x1ec   :  { %v1281_v23 = vmul.f32 %v2689_v31, %v3286_v2  ;;  %v614_v22 = vadd.f32 %v587_v19, %v3287_v15  ;;  %642 = vxpose.xlu1.b32.start [1/16] (narrow) %v2689_v31, 8  ;;  %v1754_v34 = vpop.eup %1753  ;;  %v3294_v15 = vld [vmem:[#allocation27_spill] sm:$0xff] }
 0x1ed   :  { %v541_v16 = vpop.xlane.xlu1 %540 }
 0x1ee   :  { %1297 = vst [vmem:[#allocation13] sm:$0xff] %v1281_v23  ;;  %1767 = vtanh.f32 %v614_v22  ;;  %v589_v18 = vmul.f32 %v1754_v34, %v541_v16  ;;  %v3295_v34 = vld [vmem:[#allocation73_spill] sm:$0xff] }
 0x1ef   :  { %v2696_v25 = vpop.eup %1755  ;;  %1769 = vrcp.f32 %v571_v17 }
 0x1f0   :  { %v1282_v63 = vmul.f32 %v2696_v25, %v3288_v6  ;;  %v615_v35 = vadd.f32 %v589_v18, %v3289_v14  ;;  %643 = vxpose.xlu1.b32.cont [2/16] (narrow) %v2696_v25, 8  ;;  %v1758_v13 = vpop.eup %1757  ;;  %v3296_v14 = vld [vmem:[#allocation29_spill] sm:$0xff] }
 0x1f1   :  { %v543_v28 = vpop.xlane.xlu1 %542 }
 0x1f2   :  { %1298 = vst [vmem:[#allocation13 + $0x8] sm:$0xff] %v1282_v63  ;;  %1771 = vtanh.f32 %v615_v35  ;;  %v591_v56 = vmul.f32 %v1758_v13, %v543_v28  ;;  %v3297_v13 = vld [vmem:[#allocation77_spill] sm:$0xff] }
 0x1f3   :  { %v2703_v24 = vpop.eup %1759  ;;  %1773 = vrcp.f32 %v572_v10 }
 0x1f4   :  { %v1283_v4 = vmul.f32 %v2703_v24, %v3290_v59  ;;  %v616_v45 = vadd.f32 %v591_v56, %v3291_v26  ;;  %644 = vxpose.xlu1.b32.cont [3/16] (narrow) %v2703_v24, 8  ;;  %v1762_v54 = vpop.eup %1761 }
 0x1f5   :  { %v545_v30 = vpop.xlane.xlu1 %544 }
 0x1f6   :  { %1299 = vst [vmem:[#allocation13 + $0x10] sm:$0xff] %v1283_v4  ;;  %1775 = vtanh.f32 %v616_v45  ;;  %v593_v44 = vmul.f32 %v1762_v54, %v545_v30  ;;  %v3298_v45 = vld [vmem:[#allocation30_spill] sm:$0xff]  ;;  %v3299_v30 = vld [vmem:[#allocation75_spill] sm:$0xff] }
 0x1f7   :  { %v2709_v39 = vpop.eup %1763 }
 0x1f8   :  { %v1284_v49 = vmul.f32 %v2709_v39, %v3292_v32  ;;  %v617_v48 = vadd.f32 %v593_v44, %v3293_v29  ;;  %645 = vxpose.xlu1.b32.cont [4/16] (narrow) %v2709_v39, 8  ;;  %v1766_v19 = vpop.eup %1765  ;;  %v3301_v29 = vld [vmem:[#allocation32_spill] sm:$0xff] }
 0x1f9   :  { %v547_v17 = vpop.xlane.xlu1 %546 }
 0x1fa   :  { %1300 = vst [vmem:[#allocation13 + $0x18] sm:$0xff] %v1284_v49  ;;  %1777 = vtanh.f32 %v617_v48  ;;  %v595_v2 = vmul.f32 %v1766_v19, %v547_v17 }
 0x1fb   :  { %v2715_v23 = vpop.eup %1767 }
 0x1fc   :  { %v1285_v22 = vmul.f32 %v2715_v23, %v3294_v15  ;;  %v618_v16 = vadd.f32 %v595_v2, %v3295_v34  ;;  %646 = vxpose.xlu1.b32.cont [5/16] (narrow) %v2715_v23, 8  ;;  %v1770_v18 = vpop.eup %1769  ;;  %v3303_v2 = vld [vmem:[#allocation31_spill] sm:$0xff] }
 0x1fd   :  { %v549_v10 = vpop.xlane.xlu1 %548 }
 0x1fe   :  { %1301 = vst [vmem:[#allocation13 + $0x20] sm:$0xff] %v1285_v22  ;;  %1779 = vtanh.f32 %v618_v16  ;;  %v597_v6 = vmul.f32 %v1770_v18, %v549_v10  ;;  %v3305_v16 = vld [vmem:[#allocation34_spill] sm:$0xff] }
 0x1ff   :  { %v2721_v63 = vpop.eup %1771 }
 0x200   :  { %v1286_v35 = vmul.f32 %v2721_v63, %v3296_v14  ;;  %v619_v28 = vadd.f32 %v597_v6, %v3297_v13  ;;  %647 = vxpose.xlu1.b32.cont [6/16] (narrow) %v2721_v63, 8  ;;  %v1774_v56 = vpop.eup %1773  ;;  %v3307_v14 = vld [vmem:[#allocation33_spill] sm:$0xff] }
 0x201   :  { %v551_v59 = vpop.xlane.xlu1 %550 }
 0x202   :  { %1302 = vst [vmem:[#allocation13 + $0x28] sm:$0xff] %v1286_v35  ;;  %1781 = vtanh.f32 %v619_v28  ;;  %v599_v4 = vmul.f32 %v1774_v56, %v551_v59  ;;  %v574_v59 = vmax.f32 %v2676_v43, 1.0 }
 0x203   :  { %v2727_v26 = vpop.eup %1775 }
 0x204   :  { %v1287_v54 = vmul.f32 %v2727_v26, %v3298_v45  ;;  %v620_v44 = vadd.f32 %v599_v4, %v3299_v30  ;;  %648 = vxpose.xlu1.b32.cont [7/16] (narrow) %v2727_v26, 8  ;;  %v575_v45 = vmax.f32 %v2679_v61, 1.0  ;;  %v576_v30 = vmax.f32 %v2667_v1, 1.0 }
 0x205   :  { %v2733_v32 = vpop.xlane.xlu1 %908 }
 0x206   :  { %3300 = vst [vmem:[#allocation28_spill] sm:$0xff] %v2733_v32  ;;  %1303 = vst [vmem:[#allocation13 + $0x30] sm:$0xff] %v1287_v54  ;;  %1783 = vtanh.f32 %v620_v44 }
 0x207   :  { %v2735_v49 = vpop.eup %1777  ;;  %1785 = vrcp.f32 %v574_v59  ;;  %v3316_v59 = vld [vmem:[#allocation79_spill] sm:$0xff] }
 0x208   :  { %v1288_v48 = vmul.f32 %v2735_v49, %v3301_v29  ;;  %649 = vxpose.xlu1.b32.cont [8/16] (narrow) %v2735_v49, 8  ;;  %1787 = vrcp.f32 %v575_v45  ;;  %v577_v29 = vmax.f32 %v2669_v7, 1.0 }
 0x209   :  { %v2740_v19 = vpop.xlane.xlu1 %910  ;;  %1789 = vrcp.f32 %v576_v30 }
 0x20a   :  { %3302 = vst [vmem:[#allocation23_spill] sm:$0xff] %v2740_v19  ;;  %1304 = vst [vmem:[#allocation13 + $0x38] sm:$0xff] %v1288_v48  ;;  %1791 = vrcp.f32 %v577_v29 }
 0x20b   :  { %v2742_v17 = vpop.eup %1779 }
 0x20c   :  { %v1289_v15 = vmul.f32 %v2742_v17, %v3303_v2  ;;  %650 = vxpose.xlu1.b32.cont [9/16] (narrow) %v2742_v17, 8 }
 0x20d   :  { %v2747_v22 = vpop.xlane.xlu1 %912 }
 0x20e   :  { %3304 = vst [vmem:[#allocation24_spill] sm:$0xff] %v2747_v22  ;;  %1305 = vst [vmem:[#allocation13 + $0x40] sm:$0xff] %v1289_v15 }
 0x20f   :  { %v2749_v34 = vpop.eup %1781 }
 0x210   :  { %v1290_v18 = vmul.f32 %v2749_v34, %v3305_v16  ;;  %651 = vxpose.xlu1.b32.cont [10/16] (narrow) %v2749_v34, 8  ;;  %v3315_v16 = vld [vmem:[#allocation76_spill] sm:$0xff] }
 0x211   :  { %v2754_v10 = vpop.xlane.xlu1 %914 }
 0x212   :  { %3306 = vst [vmem:[#allocation20_spill] sm:$0xff] %v2754_v10  ;;  %1306 = vst [vmem:[#allocation13 + $0x48] sm:$0xff] %v1290_v18  ;;  %v3336_v10 = vld [vmem:[#allocation84_spill] sm:$0xff] }
 0x213   :  { %v2756_v6 = vpop.eup %1783 }
 0x214   :  { %v1291_v35 = vmul.f32 %v2756_v6, %v3307_v14  ;;  %652 = vxpose.xlu1.b32.cont [11/16] (narrow) %v2756_v6, 8  ;;  %v1786_v2 = vpop.eup %1785 }
 0x215   :  { %v2761_v13 = vpop.xlane.xlu1 %916  ;;  %v1788_v14 = vpop.eup %1787 }
 0x216   :  { %3308 = vst [vmem:[#allocation66_spill] sm:$0xff] %v2761_v13  ;;  %1307 = vst [vmem:[#allocation13 + $0x50] sm:$0xff] %v1291_v35  ;;  %v1790_v45 = vpop.eup %1789 }
 0x217   :  { %v1792_v51 = vpop.eup %1791 }
 0x218   :  { %653 = vxpose.xlu1.b32.cont [12/16] (narrow) %v2671_v20, 8 }
 0x219   :  { %v2764_v28 = vpop.xlane.xlu1 %918 }
 0x21a   :  { %3309 = vst [vmem:[#allocation21_spill] sm:$0xff] %v2764_v28  ;;  %v3335_v28 = vld [vmem:[#allocation83_spill] sm:$0xff] }
 0x21d   :  { %v2766_v56 = vpop.xlane.xlu1 %922 }
 0x21e   :  { %3310 = vst [vmem:[#allocation67_spill] sm:$0xff] %v2766_v56 }
 0x221   :  { %v2769_v4 = vpop.xlane.xlu1 %924 }
 0x222   :  { %3311 = vst [vmem:[#allocation68_spill] sm:$0xff] %v2769_v4  ;;  %v3334_v4 = vld [vmem:[#allocation65_spill] sm:$0xff] }
 0x225   :  { %v2772_v54 = vpop.xlane.xlu1 %926 }
 0x226   :  { %3312 = vst [vmem:[#allocation69_spill] sm:$0xff] %v2772_v54 }
 0x229   :  { %v2775_v44 = vpop.xlane.xlu1 %928 }
 0x22a   :  { %3313 = vst [vmem:[#allocation19_spill] sm:$0xff] %v2775_v44  ;;  %v3333_v44 = vld [vmem:[#allocation64_spill] sm:$0xff] }
 0x22d   :  { %v2778_v48 = vpop.xlane.xlu1 %930 }
 0x22e   :  { %3314 = vst [vmem:[#allocation70_spill] sm:$0xff] %v2778_v48  ;;  %v3332_v48 = vld [vmem:[#allocation62_spill] sm:$0xff] }
 0x231   :  { %v555_v43 = vpop.xlane.xlu1 %554 }
 0x232   :  { %v603_v15 = vmul.f32 %v1786_v2, %v555_v43 }
 0x234   :  { %v622_v18 = vadd.f32 %v603_v15, %v3315_v16  ;;  %v1801_v15 = vld [vmem:[#allocation2 + $0x60] sm:$0xff] }
 0x235   :  { %v557_v61 = vpop.xlane.xlu1 %556 }
 0x236   :  { %1793 = vtanh.f32 %v622_v18  ;;  %v605_v35 = vmul.f32 %v1788_v14, %v557_v61  ;;  %v3320_v61 = vld [vmem:[#allocation38_spill] sm:$0xff] }
 0x238   :  { %v623_v1 = vadd.f32 %v605_v35, %v3316_v59  ;;  %v3321_v59 = vld [vmem:[#allocation48_spill] sm:$0xff] }
 0x239   :  { %v559_v8 = vpop.xlane.xlu1 %558 }
 0x23a   :  { %1795 = vtanh.f32 %v623_v1  ;;  %v607_v30 = vmul.f32 %v1790_v45, %v559_v8  ;;  %v3319_v8 = vld [vmem:[#allocation35_spill] sm:$0xff]  ;;  %v3322_v1 = vld [vmem:[#allocation40_spill] sm:$0xff] }
 0x23b   :  { %v843_v45 = vmax.f32 %v3322_v1, %v3321_v59 }
 0x23c   :  { %v624_v7 = vadd.f32 %v607_v30, %v3317_v38  ;;  %v3323_v30 = vld [vmem:[#allocation50_spill] sm:$0xff] }
 0x23d   :  { %v561_v57 = vpop.xlane.xlu1 %560 }
 0x23e   :  { %1797 = vtanh.f32 %v624_v7  ;;  %v609_v29 = vmul.f32 %v1792_v51, %v561_v57  ;;  %v3324_v7 = vld [vmem:[#allocation42_spill] sm:$0xff] }
 0x240   :  { %v625_v2 = vadd.f32 %v609_v29, %v3318_v41  ;;  %v1802_v41 = vld [vmem:[#allocation2 + $0x70] sm:$0xff]  ;;  %v844_v29 = vmax.f32 %v3324_v7, %v3323_v30 }
 0x242   :  { %1799 = vtanh.f32 %v625_v2  ;;  %v3325_v2 = vld [vmem:[#allocation52_spill] sm:$0xff]  ;;  %v848_v11 = vmax.f32 %v844_v29, %v3330_v27 }
 0x243   :  { %v2784_v43 = vpop.eup %1793 }
 0x244   :  { %v1293_v16 = vmul.f32 %v1801_v15, %v2784_v43  ;;  %654 = vxpose.xlu1.b32.cont [13/16] (narrow) %v2784_v43, 8  ;;  %v3326_v15 = vld [vmem:[#allocation44_spill] sm:$0xff]  ;;  %v852_v56 = vmax.f32 %v848_v11, %v3334_v4 }
 0x246   :  { %1309 = vst [vmem:[#allocation13 + $0x60] sm:$0xff] %v1293_v16  ;;  %v845_v16 = vmax.f32 %v3326_v15, %v3325_v2 }
 0x247   :  { %v2788_v18 = vpop.eup %1795 }
 0x248   :  { %v1294_v38 = vmul.f32 %v2788_v18, %v3319_v8  ;;  %655 = vxpose.xlu1.b32.cont [14/16] (narrow) %v2788_v18, 8  ;;  %v3327_v8 = vld [vmem:[#allocation54_spill] sm:$0xff] }
 0x24a   :  { %1310 = vst [vmem:[#allocation13 + $0x68] sm:$0xff] %v1294_v38  ;;  %v3328_v38 = vld [vmem:[#allocation46_spill] sm:$0xff] }
 0x24b   :  { %v2793_v51 = vpop.eup %1797 }
 0x24c   :  { %v1295_v57 = vmul.f32 %v1802_v41, %v2793_v51  ;;  %656 = vxpose.xlu1.b32.cont [15/16] (narrow) %v2793_v51, 8  ;;  %v846_v41 = vmax.f32 %v3328_v38, %v3327_v8 }
 0x24e   :  { %1311 = vst [vmem:[#allocation13 + $0x70] sm:$0xff] %v1295_v57  ;;  %v3329_v57 = vld [vmem:[#allocation56_spill] sm:$0xff] }
 0x24f   :  { %v2797_v14 = vpop.eup %1799  ;;  %v847_v37 = vmax.f32 %v843_v45, %v3329_v57 }
 0x250   :  { %v1296_v35 = vmul.f32 %v2797_v14, %v3320_v61  ;;  %657 = vxpose.xlu1.b32.end [16/16] (narrow) %v2797_v14, 8  ;;  %v3331_v61 = vld [vmem:[#allocation60_spill] sm:$0xff] }
 0x251   :  { %v849_v55 = vmax.f32 %v845_v16, %v3331_v61  ;;  %v851_v54 = vmax.f32 %v847_v37, %v3333_v44 }
 0x252   :  { %1312 = vst [vmem:[#allocation13 + $0x78] sm:$0xff] %v1296_v35  ;;  %v850_v35 = vmax.f32 %v846_v41, %v3332_v48 }
 0x253   :  { %v853_v13 = vmax.f32 %v849_v55, %v3335_v28  ;;  %v855_v19 = vmax.f32 %v851_v54, %v852_v56 }
 0x254   :  { %v854_v22 = vmax.f32 %v850_v35, %v3336_v10 }
 0x256   :  { %v856_v32 = vmax.f32 %v853_v13, %v854_v22 }
 0x258   :  { %v857_v3 = vmax.f32 %v855_v19, %v856_v32 }
 0x25a   :  { %v858_v50 = vrot.slane %v857_v3, 4 }
 0x25c   :  { %v2819_v29 = vmax.f32 %v857_v3, %v858_v50 }
 0x290   :  { %v658_v40 = vpop.trf.xlu1 }
 0x291   :  { %v693_v45 = vrot.slane %v658_v40, %v2528_v9 }
 0x293   :  { %vm694_vm13 = vcmp.lt.f32.partialorder %v693_v45, %v2689_v31  ;;  %vm695_vm11 = vcmp.lt.f32.partialorder %v693_v45, %v2696_v25  ;;  %vm696_vm5 = vcmp.lt.f32.partialorder %v693_v45, %v2703_v24  ;;  %vm697_vm15 = vcmp.lt.f32.partialorder %v693_v45, %v2709_v39 }
 0x294   :  { %vm698_vm12 = vcmp.lt.f32.partialorder %v693_v45, %v2715_v23  ;;  %vm699_vm14 = vcmp.lt.f32.partialorder %v693_v45, %v2721_v63  ;;  %vm700_vm10 = vcmp.lt.f32.partialorder %v693_v45, %v2727_v26  ;;  %vm701_vm9 = vcmp.lt.f32.partialorder %v693_v45, %v2735_v49 }
 0x295   :  { %vm702_vm8 = vcmp.lt.f32.partialorder %v693_v45, %v2742_v17  ;;  %vm703_vm7 = vcmp.lt.f32.partialorder %v693_v45, %v2749_v34  ;;  %vm704_vm6 = vcmp.lt.f32.partialorder %v693_v45, %v2756_v6  ;;  %vm705_vm4 = vcmp.lt.f32.partialorder %v693_v45, %v2671_v20 }
 0x296   :  { %vm706_vm3 = vcmp.lt.f32.partialorder %v693_v45, %v2784_v43  ;;  %vm707_vm2 = vcmp.lt.f32.partialorder %v693_v45, %v2788_v18  ;;  %vm708_vm1 = vcmp.lt.f32.partialorder %v693_v45, %v2793_v51  ;;  %vm709_vm0 = vcmp.lt.f32.partialorder %v693_v45, %v2797_v14 }
 0x297   :  { %v1424_v55 = vsel %vm694_vm13, 1.0, %v3268_v33  ;;  %v1425_v11 = vsel %vm695_vm11, 1.0, %v3268_v33  ;;  %v1426_v37 = vsel %vm696_vm5, 1.0, %v3268_v33  ;;  %v1427_v50 = vsel %vm697_vm15, 1.0, %v3268_v33 }
 0x298   :  { %v1428_v3 = vsel %vm698_vm12, 1.0, %v3268_v33  ;;  %v1429_v40 = vsel %vm699_vm14, 1.0, %v3268_v33  ;;  %v1430_v31 = vsel %vm700_vm10, 1.0, %v3268_v33  ;;  %v1431_v25 = vsel %vm701_vm9, 1.0, %v3268_v33 }
 0x299   :  { %v1432_v24 = vsel %vm702_vm8, 1.0, %v3268_v33  ;;  %v1433_v39 = vsel %vm703_vm7, 1.0, %v3268_v33  ;;  %v1434_v23 = vsel %vm704_vm6, 1.0, %v3268_v33  ;;  %v1435_v63 = vsel %vm705_vm4, 1.0, %v3268_v33 }
 0x29a   :  { %v742_v26 = vmul.f32 %v1424_v55, %v3322_v1  ;;  %v743_v32 = vmul.f32 %v1425_v11, %v3324_v7  ;;  %v744_v49 = vmul.f32 %v1426_v37, %v3326_v15  ;;  %v745_v19 = vmul.f32 %v1427_v50, %v3328_v38 }
 0x29b   :  { %v746_v17 = vmul.f32 %v1428_v3, %v3321_v59  ;;  %v747_v22 = vmul.f32 %v1429_v40, %v3323_v30  ;;  %v748_v34 = vmul.f32 %v1430_v31, %v3325_v2  ;;  %v749_v6 = vmul.f32 %v1431_v25, %v3327_v8  ;;  %v827_v31 = vpop.trf.xlu0 }
 0x29c   :  { %v1436_v20 = vsel %vm706_vm3, 1.0, %v3268_v33  ;;  %v1437_v13 = vsel %vm707_vm2, 1.0, %v3268_v33  ;;  %v1438_v56 = vsel %vm708_vm1, 1.0, %v3268_v33  ;;  %v1439_v54 = vsel %vm709_vm0, 1.0, %v3268_v33 }
 0x29d   :  { %v750_v59 = vmul.f32 %v1432_v24, %v3329_v57  ;;  %v751_v1 = vmul.f32 %v1433_v39, %v3330_v27  ;;  %v752_v30 = vmul.f32 %v1434_v23, %v3331_v61  ;;  %v753_v43 = vmul.f32 %v1435_v63, %v3332_v48 }
 0x29e   :  { %v758_v7 = vmax.f32 %v742_v26, %v746_v17  ;;  %v759_v2 = vmax.f32 %v743_v32, %v747_v22  ;;  %v760_v18 = vmax.f32 %v744_v49, %v748_v34  ;;  %v761_v15 = vmax.f32 %v745_v19, %v749_v6  ;;  %v3337_v17 = vld [vmem:[#allocation87_spill] sm:$0xff]  ;;  %v3338_v22 = vld [vmem:[#allocation85_spill] sm:$0xff]  ;;  %v3339_v34 = vld [vmem:[#allocation86_spill] sm:$0xff] }
 0x29f   :  { %v754_v16 = vmul.f32 %v1436_v20, %v3333_v44  ;;  %v755_v51 = vmul.f32 %v1437_v13, %v3334_v4  ;;  %v756_v8 = vmul.f32 %v1438_v56, %v3335_v28  ;;  %v757_v33 = vmul.f32 %v1439_v54, %v3336_v10  ;;  %v3340_v6 = vld [vmem:[#allocation28_spill] sm:$0xff]  ;;  %v3344_v56 = vld [vmem:[#allocation66_spill] sm:$0xff]  ;;  %v3345_v54 = vld [vmem:[#allocation21_spill] sm:$0xff] }
 0x2a0   :  { %v762_v14 = vmax.f32 %v758_v7, %v750_v59  ;;  %v763_v38 = vmax.f32 %v759_v2, %v751_v1  ;;  %v764_v41 = vmax.f32 %v760_v18, %v752_v30  ;;  %v765_v27 = vmax.f32 %v761_v15, %v753_v43  ;;  %v3342_v20 = vld [vmem:[#allocation24_spill] sm:$0xff]  ;;  %v921_v59 = vpop.xlane.xlu0 %920  ;;  %v3346_v30 = vld [vmem:[#allocation67_spill] sm:$0xff]  ;;  %v3348_v18 = vld [vmem:[#allocation69_spill] sm:$0xff] }
 0x2a1   :  { %v860_v57 = vrot.slane %v2819_v29, 2  ;;  %v3343_v13 = vld [vmem:[#allocation20_spill] sm:$0xff]  ;;  %vm1278_vm0 = vcmask 1040384  }
 0x2a2   :  { %v766_v61 = vmax.f32 %v762_v14, %v754_v16  ;;  %v767_v48 = vmax.f32 %v763_v38, %v755_v51  ;;  %v768_v35 = vmax.f32 %v764_v41, %v756_v8  ;;  %v769_v45 = vmax.f32 %v765_v27, %v757_v33  ;;  %v3347_v7 = vld [vmem:[#allocation68_spill] sm:$0xff]  ;;  %v3349_v51 = vld [vmem:[#allocation19_spill] sm:$0xff]  ;;  %v3350_v33 = vld [vmem:[#allocation70_spill] sm:$0xff] }
 0x2a3   :  { %v861_v44 = vmax.f32 %v2819_v29, %v860_v57 }
 0x2a4   :  { %v770_v55 = vmax.f32 %v766_v61, %v767_v48  ;;  %v771_v11 = vmax.f32 %v768_v35, %v769_v45  ;;  %v933_v16 = vpop.xlane.xlu0 %932 }
 0x2a5   :  { %v862_v50 = vrot.slane %v861_v44, 1 }
 0x2a6   :  { %v772_v37 = vmax.f32 %v770_v55, %v771_v11 }
 0x2a7   :  { %v863_v10 = vmax.f32 %v861_v44, %v862_v50  ;;  %v1804_v50 = vld [vmem:[#allocation5 + $0x78] sm:$0xff] }
 0x2a8   :  { %v773_v4 = vrot.slane %v772_v37, 4  ;;  %v935_v14 = vpop.xlane.xlu0 %934 }
 0x2a9   :  { %v864_v39 = vmax.f32 %v827_v31, %v863_v10  ;;  %v1805_v10 = vld [vmem:[#allocation5 + $0x60] sm:$0xff]  ;;  %v1806_v31 = vld [vmem:[#allocation5 + $0x68] sm:$0xff] }
 0x2aa   :  { %v774_v28 = vmax.f32 %v772_v37, %v773_v4  ;;  %v1803_v4 = vld [vmem:[#allocation5 + $0x70] sm:$0xff] }
 0x2ac   :  { %v775_v3 = vrot.slane %v774_v28, 2  ;;  %v937_v27 = vpop.xlane.xlu0 %936 }
 0x2ae   :  { %v776_v40 = vmax.f32 %v774_v28, %v775_v3  ;;  %v891_v28 = vmax.f32 %v1804_v50, %v1803_v4 }
 0x2b0   :  { %v777_v25 = vrot.slane %v776_v40, 1  ;;  %v939_v61 = vpop.xlane.xlu0 %938 }
 0x2b2   :  { %v778_v24 = vmax.f32 %v776_v40, %v777_v25  ;;  %v892_v40 = vmax.f32 %v1805_v10, %v891_v28 }
 0x2b4   :  { %v865_v23 = vsub.f32 1.0, %v778_v24  ;;  %v893_v25 = vmax.f32 %v1806_v31, %v892_v40  ;;  %v1807_v24 = vld [vmem:[#allocation5 + $0x50] sm:$0xff] }
 0x2b6   :  { %v2903_v63 = vmul.f32 %v865_v23, %v864_v39  ;;  %v894_v39 = vmax.f32 %v1807_v24, %v893_v25  ;;  %v1808_v23 = vld [vmem:[#allocation5 + $0x58] sm:$0xff] }
 0x2b8   :  { %v870_v26 = vrot.slane %v2903_v63, %v2528_v9 }
 0x2ba   :  { %v2908_v32 = vmul.f32 %v870_v26, %v2514_v62  ;;  %v2912_v29 = vmul.f32 %v870_v26, %v2524_v21  ;;  %v2916_v49 = vmul.f32 %v870_v26, %v2462_v5  ;;  %v2920_v19 = vmul.f32 %v870_v26, %v2480_v60 }
 0x2bb   :  { %v2924_v62 = vmul.f32 %v870_v26, %v2584_v47  ;;  %v2928_v21 = vmul.f32 %v870_v26, %v2590_v53  ;;  %v2932_v5 = vmul.f32 %v870_v26, %v2554_v0  ;;  %v2936_v60 = vmul.f32 %v870_v26, %v2562_v42 }
 0x2bc   :  { %994 = vmax.xlane.f32.xlu1 %v2908_v32  ;;  %v2940_v47 = vmul.f32 %v870_v26, %v2534_v52  ;;  %v2944_v53 = vmul.f32 %v870_v26, %v2547_v46  ;;  %v2948_v0 = vmul.f32 %v870_v26, %v2496_v58  ;;  %v2952_v42 = vmul.f32 %v870_v26, %v2505_v36 }
 0x2bd   :  { %v2956_v52 = vmul.f32 %v870_v26, %v2596_v12  ;;  %v2960_v46 = vmul.f32 %v870_v26, %v3337_v17  ;;  %v2964_v58 = vmul.f32 %v870_v26, %v3338_v22  ;;  %v2968_v36 = vmul.f32 %v870_v26, %v3339_v34  ;;  %v3341_v12 = vld [vmem:[#allocation23_spill] sm:$0xff] }
 0x2be   :  { %v895_v26 = vmax.f32 %v1808_v23, %v894_v39  ;;  %v1809_v17 = vld [vmem:[#allocation5 + $0x40] sm:$0xff]  ;;  %v1810_v34 = vld [vmem:[#allocation5 + $0x48] sm:$0xff] }
 0x2c0   :  { %996 = vmax.xlane.f32.xlu1 %v2912_v29  ;;  %v896_v22 = vmax.f32 %v1809_v17, %v895_v26 }
 0x2c4   :  { %998 = vmax.xlane.f32.xlu1 %v2916_v49 }
 0x2c8   :  { %1000 = vmax.xlane.f32.xlu1 %v2920_v19 }
 0x2cc   :  { %1002 = vmax.xlane.f32.xlu1 %v2924_v62 }
 0x2d0   :  { %1004 = vmax.xlane.f32.xlu1 %v2928_v21 }
 0x2d4   :  { %1006 = vmax.xlane.f32.xlu1 %v2932_v5 }
 0x2d8   :  { %1008 = vmax.xlane.f32.xlu1 %v2936_v60 }
 0x2dc   :  { %1010 = vmax.xlane.f32.xlu1 %v2940_v47 }
 0x2e0   :  { %1012 = vmax.xlane.f32.xlu1 %v2944_v53 }
 0x2e4   :  { %1014 = vmax.xlane.f32.xlu1 %v2948_v0 }
 0x2e8   :  { %1016 = vmax.xlane.f32.xlu1 %v2952_v42 }
 0x2ec   :  { %1018 = vmax.xlane.f32.xlu1 %v2956_v52 }
 0x2f0   :  { %1020 = vmax.xlane.f32.xlu1 %v2960_v46 }
 0x2f4   :  { %1022 = vmax.xlane.f32.xlu1 %v2964_v58 }
 0x2f8   :  { %1024 = vmax.xlane.f32.xlu1 %v2968_v36 }
 0x32b   :  { %940 = vxpose.xlu1.b32.start [1/16] (narrow) %v3340_v6, 8  ;;  %v897_v6 = vmax.f32 %v1810_v34, %v896_v22 }
 0x32f   :  { %941 = vxpose.xlu1.b32.cont [2/16] (narrow) %v3341_v12, 8  ;;  %v1811_v12 = vld [vmem:[#allocation5 + $0x20] sm:$0xff] }
 0x333   :  { %942 = vxpose.xlu1.b32.cont [3/16] (narrow) %v3342_v20, 8  ;;  %v1812_v20 = vld [vmem:[#allocation5] sm:$0xff] }
 0x337   :  { %943 = vxpose.xlu1.b32.cont [4/16] (narrow) %v3343_v13, 8  ;;  %v887_v13 = vmax.f32 %v1812_v20, %v1811_v12 }
 0x33b   :  { %944 = vxpose.xlu1.b32.cont [5/16] (narrow) %v3344_v56, 8  ;;  %v973_v56 = vmax.f32 %v2908_v32, %v2924_v62 }
 0x33f   :  { %945 = vxpose.xlu1.b32.cont [6/16] (narrow) %v3345_v54, 8  ;;  %v974_v54 = vmax.f32 %v2912_v29, %v2928_v21 }
 0x343   :  { %946 = vxpose.xlu1.b32.cont [7/16] (narrow) %v921_v59, 8  ;;  %v975_v59 = vmax.f32 %v2916_v49, %v2932_v5 }
 0x345   :  { %v995_v1 = vpop.xlane.xlu1 %994 }
 0x346   :  { %1026 = vxpose.xlu0.b32.start [1/16] (narrow) %v995_v1, 8  ;;  %v976_v1 = vmax.f32 %v2920_v19, %v2936_v60 }
 0x347   :  { %947 = vxpose.xlu1.b32.cont [8/16] (narrow) %v3346_v30, 8  ;;  %v898_v30 = vmax.f32 %v887_v13, %v897_v6 }
 0x349   :  { %v997_v43 = vpop.xlane.xlu1 %996 }
 0x34a   :  { %1027 = vxpose.xlu0.b32.cont [2/16] (narrow) %v997_v43, 8  ;;  %v1813_v43 = vld [vmem:[#allocation5 + $0x28] sm:$0xff] }
 0x34b   :  { %948 = vxpose.xlu1.b32.cont [9/16] (narrow) %v3347_v7, 8  ;;  %v1814_v7 = vld [vmem:[#allocation5 + $0x8] sm:$0xff] }
 0x34d   :  { %v999_v2 = vpop.xlane.xlu1 %998 }
 0x34e   :  { %1028 = vxpose.xlu0.b32.cont [3/16] (narrow) %v999_v2, 8  ;;  %v888_v2 = vmax.f32 %v1814_v7, %v1813_v43  ;;  %v3351_v43 = vld [vmem:[#allocation36_spill] sm:$0xff]  ;;  %v3352_v7 = vld [vmem:[#allocation37_spill] sm:$0xff] }
 0x34f   :  { %949 = vxpose.xlu1.b32.cont [10/16] (narrow) %v3348_v18, 8  ;;  %v977_v18 = vmax.f32 %v973_v56, %v2940_v47  ;;  %vm3353_vm1 = vcmp.ne.s32.totalorder %v3351_v43, %v3352_v7 }
 0x351   :  { %v1001_v15 = vpop.xlane.xlu1 %1000 }
 0x352   :  { %1029 = vxpose.xlu0.b32.cont [4/16] (narrow) %v1001_v15, 8  ;;  %v978_v15 = vmax.f32 %v974_v54, %v2944_v53 }
 0x353   :  { %950 = vxpose.xlu1.b32.cont [11/16] (narrow) %v3349_v51, 8  ;;  %v980_v51 = vmax.f32 %v976_v1, %v2952_v42 }
 0x355   :  { %v1003_v8 = vpop.xlane.xlu1 %1002 }
 0x356   :  { %1030 = vxpose.xlu0.b32.cont [5/16] (narrow) %v1003_v8, 8  ;;  %v899_v8 = vmax.f32 %v888_v2, %v898_v30 }
 0x357   :  { %951 = vxpose.xlu1.b32.cont [12/16] (narrow) %v3350_v33, 8  ;;  %v1815_v33 = vld [vmem:[#allocation5 + $0x30] sm:$0xff] }
 0x359   :  { %v1005_v38 = vpop.xlane.xlu1 %1004 }
 0x35a   :  { %1031 = vxpose.xlu0.b32.cont [6/16] (narrow) %v1005_v38, 8 }
 0x35b   :  { %952 = vxpose.xlu1.b32.cont [13/16] (narrow) %v933_v16, 8  ;;  %v979_v16 = vmax.f32 %v975_v59, %v2948_v0 }
 0x35d   :  { %v1007_v41 = vpop.xlane.xlu1 %1006 }
 0x35e   :  { %1032 = vxpose.xlu0.b32.cont [7/16] (narrow) %v1007_v41, 8  ;;  %v981_v41 = vmax.f32 %v977_v18, %v2956_v52  ;;  %v3354_v18 = vld [vmem:[#allocation39_spill] sm:$0xff] }
 0x35f   :  { %953 = vxpose.xlu1.b32.cont [14/16] (narrow) %v935_v14, 8  ;;  %v1816_v14 = vld [vmem:[#allocation5 + $0x10] sm:$0xff]  ;;  %vm3355_vm2 = vcmp.ne.s32.totalorder %v3354_v18, %v3352_v7 }
 0x360   :  { %v889_v38 = vmax.f32 %v1816_v14, %v1815_v33 }
 0x361   :  { %v1009_v57 = vpop.xlane.xlu1 %1008 }
 0x362   :  { %1033 = vxpose.xlu0.b32.cont [8/16] (narrow) %v1009_v57, 8  ;;  %v983_v57 = vmax.f32 %v979_v16, %v2964_v58  ;;  %v3356_v16 = vld [vmem:[#allocation41_spill] sm:$0xff] }
 0x363   :  { %954 = vxpose.xlu1.b32.cont [15/16] (narrow) %v937_v27, 8  ;;  %v982_v27 = vmax.f32 %v978_v15, %v2960_v46  ;;  %vm3357_vm3 = vcmp.ne.s32.totalorder %v3356_v16, %v3352_v7 }
 0x365   :  { %v1011_v48 = vpop.xlane.xlu1 %1010 }
 0x366   :  { %1034 = vxpose.xlu0.b32.cont [9/16] (narrow) %v1011_v48, 8  ;;  %v900_v48 = vmax.f32 %v889_v38, %v899_v8 }
 0x367   :  { %955 = vxpose.xlu1.b32.end [16/16] (narrow) %v939_v61, 8  ;;  %v984_v61 = vmax.f32 %v980_v51, %v2968_v36 }
 0x369   :  { %v1013_v35 = vpop.xlane.xlu1 %1012 }
 0x36a   :  { %1035 = vxpose.xlu0.b32.cont [10/16] (narrow) %v1013_v35, 8  ;;  %v1817_v35 = vld [vmem:[#allocation5 + $0x38] sm:$0xff] }
 0x36d   :  { %v1015_v45 = vpop.xlane.xlu1 %1014 }
 0x36e   :  { %1036 = vxpose.xlu0.b32.cont [11/16] (narrow) %v1015_v45, 8  ;;  %v1818_v45 = vld [vmem:[#allocation5 + $0x18] sm:$0xff] }
 0x371   :  { %v1017_v55 = vpop.xlane.xlu1 %1016 }
 0x372   :  { %1037 = vxpose.xlu0.b32.cont [12/16] (narrow) %v1017_v55, 8  ;;  %v890_v55 = vmax.f32 %v1818_v45, %v1817_v35 }
 0x375   :  { %v1019_v11 = vpop.xlane.xlu1 %1018 }
 0x376   :  { %1038 = vxpose.xlu0.b32.cont [13/16] (narrow) %v1019_v11, 8  ;;  %v986_v11 = vmax.f32 %v983_v57, %v984_v61  ;;  %v3368_v61 = vld [vmem:[#allocation53_spill] sm:$0xff] }
 0x377   :  { %vm3369_vm10 = vcmp.ne.s32.totalorder %v3368_v61, %v3352_v7 }
 0x379   :  { %v1021_v44 = vpop.xlane.xlu1 %1020 }
 0x37a   :  { %1039 = vxpose.xlu0.b32.cont [14/16] (narrow) %v1021_v44, 8  ;;  %v985_v44 = vmax.f32 %v981_v41, %v982_v27 }
 0x37c   :  { %v987_v4 = vmax.f32 %v985_v44, %v986_v11  ;;  %v3376_v44 = vld [vmem:[#allocation61_spill] sm:$0xff] }
 0x37d   :  { %v1023_v37 = vpop.xlane.xlu1 %1022  ;;  %vm3377_vm11 = vcmp.ne.s32.totalorder %v3376_v44, %v3352_v7 }
 0x37e   :  { %1040 = vxpose.xlu0.b32.cont [15/16] (narrow) %v1023_v37, 8  ;;  %v901_v37 = vmax.f32 %v890_v55, %v900_v48  ;;  %v988_v28 = vrot.slane %v987_v4, 4 }
 0x380   :  { %v902_v50 = vrot.slane %v901_v37, 4  ;;  %v989_v10 = vmax.f32 %v987_v4, %v988_v28  ;;  %v3382_v28 = vld [vmem:[#allocation82_spill] sm:$0xff] }
 0x381   :  { %v1025_v3 = vpop.xlane.xlu1 %1024 }
 0x382   :  { %1041 = vxpose.xlu0.b32.end [16/16] (narrow) %v1025_v3, 8  ;;  %v903_v3 = vmax.f32 %v901_v37, %v902_v50  ;;  %v990_v31 = vrot.slane %v989_v10, 2  ;;  %v3380_v50 = vld [vmem:[#allocation81_spill] sm:$0xff] }
 0x383   :  { %vm3381_vm15 = vcmp.ne.s32.totalorder %v3380_v50, %v3352_v7 }
 0x384   :  { %v904_v40 = vrot.slane %v903_v3, 2  ;;  %v991_v24 = vmax.f32 %v989_v10, %v990_v31 }
 0x386   :  { %v905_v25 = vmax.f32 %v903_v3, %v904_v40  ;;  %v992_v23 = vrot.slane %v991_v24, 1 }
 0x388   :  { %v906_v39 = vrot.slane %v905_v25, 1  ;;  %v993_v22 = vmax.f32 %v991_v24, %v992_v23 }
 0x38a   :  { %v907_v26 = vmax.f32 %v905_v25, %v906_v39 }
 0x3a7   :  { %v956_v17 = vpop.trf.xlu1 }
 0x3a8   :  { %v972_v12 = vmax.f32 %v907_v26, %v956_v17 }
 0x3c2   :  { %v1042_v34 = vpop.trf.xlu0 }
 0x3c3   :  { %v1058_v6 = vmax.f32 %v993_v22, %v1042_v34 }
 0x3c5   :  { %v1059_v20 = vsub.f32 1.0, %v1058_v6 }
 0x3c7   :  { %v1060_v13 = vmul.f32 %v1059_v20, %v972_v12 }
 0x3c9   :  { %v1061_v56 = vadd.f32 %v1060_v13, %v2903_v63  ;;  %v1276_v54 = vrot.slane %v1060_v13, 7 }
 0x3cb   :  { %v1062_v59 = vmin.f32 %v1061_v56, 1.0  ;;  %v1279_v1 = vsel %vm1278_vm0, %v2903_v63, %v1276_v54  ;;  %v3358_v63 = vld [vmem:[#allocation43_spill] sm:$0xff]  ;;  %vm3383_vm0 = vcmp.ne.s32.totalorder %v3382_v28, %v3352_v7 }
 0x3cc   :  { %1280 = vst [vmem:[#allocation11] sm:$0x3] %v1279_v1  ;;  %vm3359_vm4 = vcmp.ne.s32.totalorder %v3358_v63, %v3352_v7 }
 0x3cd   :  { %v1066_v30 = vrot.slane %v1062_v59, %v2528_v9 }
 0x3cf   :  { %v1067_v2 = vsel %vm3353_vm1, %v2908_v32, %v1066_v30  ;;  %v1068_v15 = vsel %vm3355_vm2, %v2912_v29, %v1066_v30  ;;  %v1069_v51 = vsel %vm3357_vm3, %v2916_v49, %v1066_v30  ;;  %v1070_v9 = vsel %vm3359_vm4, %v2920_v19, %v1066_v30  ;;  %v3360_v32 = vld [vmem:[#allocation45_spill] sm:$0xff]  ;;  %v3362_v29 = vld [vmem:[#allocation47_spill] sm:$0xff] }
 0x3d0   :  { %1163 = vxpose.xlu0.b32.start [1/16] %v1067_v2, 128  ;;  %v1563_v8 = vpack.c.bf16 %v1068_v15, %v1067_v2  ;;  %v1568_v33 = vpack.c.bf16 %v1070_v9, %v1069_v51  ;;  %vm3361_vm6 = vcmp.ne.s32.totalorder %v3360_v32, %v3352_v7  ;;  %vm3363_vm7 = vcmp.ne.s32.totalorder %v3362_v29, %v3352_v7  ;;  %v3364_v49 = vld [vmem:[#allocation49_spill] sm:$0xff]  ;;  %v3366_v19 = vld [vmem:[#allocation51_spill] sm:$0xff] }
 0x3d1   :  { %v1071_v14 = vsel %vm3361_vm6, %v2924_v62, %v1066_v30  ;;  %v1072_v38 = vsel %vm3363_vm7, %v2928_v21, %v1066_v30  ;;  %vm3365_vm8 = vcmp.ne.s32.totalorder %v3364_v49, %v3352_v7  ;;  %vm3367_vm9 = vcmp.ne.s32.totalorder %v3366_v19, %v3352_v7  ;;  %v3370_v21 = vld [vmem:[#allocation55_spill] sm:$0xff] }
 0x3d2   :  { %v1573_v41 = vpack.c.bf16 %v1072_v38, %v1071_v14  ;;  %v1073_v27 = vsel %vm3365_vm8, %v2932_v5, %v1066_v30  ;;  %v1074_v57 = vsel %vm3367_vm9, %v2936_v60, %v1066_v30  ;;  %v1075_v62 = vsel %vm3369_vm10, %v2940_v47, %v1066_v30  ;;  %1564 = vst [vmem:[#allocation7] sm:$0xff] %v1563_v8   ;;  %v3372_v5 = vld [vmem:[#allocation57_spill] sm:$0xff]  ;;  %v3374_v60 = vld [vmem:[#allocation59_spill] sm:$0xff] }
 0x3d3   :  { %1647 = vst [vmem:[#allocation7 + $0x8] sm:$0xff] %v1568_v33   ;;  %v1578_v48 = vpack.c.bf16 %v1074_v57, %v1073_v27  ;;  %vm3371_vm14 = vcmp.ne.s32.totalorder %v3370_v21, %v3352_v7  ;;  %vm3373_vm12 = vcmp.ne.s32.totalorder %v3372_v5, %v3352_v7  ;;  %vm3375_vm13 = vcmp.ne.s32.totalorder %v3374_v60, %v3352_v7 }
 0x3d4   :  { %v1076_v35 = vsel %vm3371_vm14, %v2944_v53, %v1066_v30  ;;  %v1077_v45 = vsel %vm3373_vm12, %v2948_v0, %v1066_v30  ;;  %v1078_v55 = vsel %vm3375_vm13, %v2952_v42, %v1066_v30  ;;  %1648 = vst [vmem:[#allocation7 + $0x10] sm:$0xff] %v1573_v41   ;;  %v1079_v37 = vsel %vm3377_vm11, %v2956_v52, %v1066_v30  ;;  %v3378_v53 = vld [vmem:[#allocation63_spill] sm:$0xff] }
 0x3d5   :  { %v1583_v47 = vpack.c.bf16 %v1076_v35, %v1075_v62  ;;  %v1588_v11 = vpack.c.bf16 %v1078_v55, %v1077_v45  ;;  %vm3379_vm5 = vcmp.ne.s32.totalorder %v3378_v53, %v3352_v7  ;;  %1164 = vxpose.xlu0.b32.cont [2/16] %v1068_v15, 128  ;;  %1649 = vst [vmem:[#allocation7 + $0x18] sm:$0xff] %v1578_v48  }
 0x3d6   :  { %v1080_v4 = vsel %vm3379_vm5, %v2960_v46, %v1066_v30  ;;  %v1081_v42 = vsel %vm3381_vm15, %v2964_v58, %v1066_v30  ;;  %v1082_v3 = vsel %vm3383_vm0, %v2968_v36, %v1066_v30 }
 0x3d7   :  { %v1593_v0 = vpack.c.bf16 %v1080_v4, %v1079_v37  ;;  %1650 = vst [vmem:[#allocation7 + $0x20] sm:$0xff] %v1583_v47   ;;  %1651 = vst [vmem:[#allocation7 + $0x28] sm:$0xff] %v1588_v11   ;;  %v1598_v52 = vpack.c.bf16 %v1082_v3, %v1081_v42 }
 0x3d9   :  { %1652 = vst [vmem:[#allocation7 + $0x30] sm:$0xff] %v1593_v0   ;;  %1653 = vst [vmem:[#allocation7 + $0x38] sm:$0xff] %v1598_v52   ;;  %1165 = vxpose.xlu0.b32.cont [3/16] %v1069_v51, 128 }
 0x3dd   :  { %1166 = vxpose.xlu0.b32.cont [4/16] %v1070_v9, 128 }
 0x3e1   :  { %1167 = vxpose.xlu0.b32.cont [5/16] %v1071_v14, 128 }
 0x3e5   :  { %1168 = vxpose.xlu0.b32.cont [6/16] %v1072_v38, 128 }
 0x3e9   :  { %1169 = vxpose.xlu0.b32.cont [7/16] %v1073_v27, 128 }
 0x3ed   :  { %1170 = vxpose.xlu0.b32.cont [8/16] %v1074_v57, 128 }
 0x3f1   :  { %1171 = vxpose.xlu0.b32.cont [9/16] %v1075_v62, 128 }
 0x3f5   :  { %1172 = vxpose.xlu0.b32.cont [10/16] %v1076_v35, 128 }
 0x3f9   :  { %1173 = vxpose.xlu0.b32.cont [11/16] %v1077_v45, 128 }
 0x3fd   :  { %1174 = vxpose.xlu0.b32.cont [12/16] %v1078_v55, 128 }
 0x401   :  { %1175 = vxpose.xlu0.b32.cont [13/16] %v1079_v37, 128 }
 0x405   :  { %1176 = vxpose.xlu0.b32.cont [14/16] %v1080_v4, 128 }
 0x409   :  { %1177 = vxpose.xlu0.b32.cont [15/16] %v1081_v42, 128 }
 0x40d   :  { %1178 = vxpose.xlu0.b32.end [16/16] %v1082_v3, 128 }
 0x40e   :  { %1870 = shalt.err (!%p1867_p0)
}
 0x40f   :  { %1358 = dma.vmem_to_hbm [thread:$0]  %s1356_s2, 32, %s3098_s6, [#allocation12]  }
 0x410   :  { %s1975_s17 = smov [#allocation7]  }
 0x411   :  { %s1318_s18 = sshll.u32 %s1975_s17, 4  ;;  %s1319_s18 = int_to_ptr.vmem [resolvable:$true] %s1318_s18 }
 0x412   :  { %s1879_s19 = scalar_lea.vmem %s1319_s18, 1024  ;;  %p1884_p2 = scmp.lt.s32.totalorder %s1319_s18, %s1319_s18 }
 0x413   :  { %p1880_p1 = scmp.ne.s32.totalorder %s1319_s18, %s1879_s19  ;;  %p1885_p3 = scmp.lt.s32.totalorder %s1879_s19, %s1879_s19 }
 0x415   :  { %p1886_p4 = por %p1885_p3, %p1884_p2 }
 0x417   :  { %p1887_p5 = pnand %p1886_p4, %p1880_p1 }
 0x419   :  { %1890 = shalt.err (!%p1887_p5)
}
 0x41a   :  { %s1976_s20 = smov 64   ;;  %s1977_s21 = smov 4  }
 0x41b   :  { %1324 = dma.vmem_to_hbm [thread:$0]  %s1319_s18, 1024, %s3095_s3, [#allocation4], %s1976_s20, %s1976_s20, %s1977_s21  }
 0x41c   :  { %s1978_s6 = smov [#allocation13]  }
 0x41d   :  { %s1364_s24 = sshll.u32 %s1978_s6, 4  ;;  %s1365_s24 = int_to_ptr.vmem [resolvable:$true] %s1364_s24 }
 0x41e   :  { %s1899_s25 = scalar_lea.vmem %s1365_s24, 2048  ;;  %p1904_p7 = scmp.lt.s32.totalorder %s1365_s24, %s1365_s24 }
 0x41f   :  { %p1900_p6 = scmp.ne.s32.totalorder %s1365_s24, %s1899_s25  ;;  %p1905_p8 = scmp.lt.s32.totalorder %s1899_s25, %s1899_s25 }
 0x421   :  { %p1906_p9 = por %p1905_p8, %p1904_p7 }
 0x423   :  { %p1907_p10 = pnand %p1906_p9, %p1900_p6 }
 0x425   :  { %1910 = shalt.err (!%p1907_p10)
}
 0x426   :  { %1370 = dma.vmem_to_hbm [thread:$0]  %s1365_s24, 2048, %s3099_s7, [#allocation12], %s1970_s27, %s1970_s27, %s1971_s28  }
 0x427   :  { %s1979_s3 = smov [#allocation8]   ;;  %s1980_s27 = smov [#allocation10]  }
 0x428   :  { %s1330_s7 = sshll.u32 %s1979_s3, 4  ;;  %s1342_s28 = sshll.u32 %s1980_s27, 4  ;;  %s1331_s7 = int_to_ptr.vmem [resolvable:$true] %s1330_s7  ;;  %s1343_s28 = int_to_ptr.vmem [resolvable:$true] %s1342_s28 }
 0x429   :  { %s1919_s30 = scalar_lea.vmem %s1331_s7, 1024  ;;  %p1924_p12 = scmp.lt.s32.totalorder %s1331_s7, %s1331_s7 }
 0x42a   :  { %p1920_p11 = scmp.ne.s32.totalorder %s1331_s7, %s1919_s30  ;;  %p1925_p13 = scmp.lt.s32.totalorder %s1919_s30, %s1919_s30 }
 0x42c   :  { %p1926_p0 = por %p1925_p13, %p1924_p12 }
 0x42e   :  { %p1927_p1 = pnand %p1926_p0, %p1920_p11 }
 0x44d   :  { %v1179_v46 = vpop.trf.xlu0 }
 0x451   :  { %v1180_v58 = vpop.trf.xlu0 }
 0x452   :  { %v1603_v36 = vpack.c.bf16 %v1180_v58, %v1179_v46 }
 0x454   :  { %1604 = vst [vmem:[#allocation8] sm:$0xff] %v1603_v36  }
 0x455   :  { %v1181_v10 = vpop.trf.xlu0 }
 0x459   :  { %v1182_v40 = vpop.trf.xlu0 }
 0x45a   :  { %v1608_v31 = vpack.c.bf16 %v1182_v40, %v1181_v10 }
 0x45c   :  { %1654 = vst [vmem:[#allocation8 + $0x8] sm:$0xff] %v1608_v31  }
 0x45d   :  { %v1183_v25 = vpop.trf.xlu0 }
 0x461   :  { %v1184_v24 = vpop.trf.xlu0 }
 0x462   :  { %v1613_v39 = vpack.c.bf16 %v1184_v24, %v1183_v25 }
 0x464   :  { %1655 = vst [vmem:[#allocation8 + $0x10] sm:$0xff] %v1613_v39  }
 0x465   :  { %v1185_v23 = vpop.trf.xlu0 }
 0x469   :  { %v1186_v26 = vpop.trf.xlu0 }
 0x46a   :  { %v1618_v17 = vpack.c.bf16 %v1186_v26, %v1185_v23 }
 0x46c   :  { %1656 = vst [vmem:[#allocation8 + $0x18] sm:$0xff] %v1618_v17  }
 0x46d   :  { %v1187_v22 = vpop.trf.xlu0 }
 0x471   :  { %v1188_v34 = vpop.trf.xlu0 }
 0x472   :  { %v1623_v6 = vpack.c.bf16 %v1188_v34, %v1187_v22 }
 0x474   :  { %1657 = vst [vmem:[#allocation8 + $0x20] sm:$0xff] %v1623_v6  }
 0x475   :  { %v1189_v12 = vpop.trf.xlu0 }
 0x479   :  { %v1190_v20 = vpop.trf.xlu0 }
 0x47a   :  { %v1628_v13 = vpack.c.bf16 %v1190_v20, %v1189_v12 }
 0x47c   :  { %1658 = vst [vmem:[#allocation8 + $0x28] sm:$0xff] %v1628_v13  }
 0x47d   :  { %v1191_v56 = vpop.trf.xlu0 }
 0x481   :  { %v1192_v54 = vpop.trf.xlu0 }
 0x482   :  { %v1633_v59 = vpack.c.bf16 %v1192_v54, %v1191_v56 }
 0x484   :  { %1659 = vst [vmem:[#allocation8 + $0x30] sm:$0xff] %v1633_v59  }
 0x485   :  { %v1193_v1 = vpop.trf.xlu0 }
 0x489   :  { %v1194_v30 = vpop.trf.xlu0 }
 0x48a   :  { %v1638_v43 = vpack.c.bf16 %v1194_v30, %v1193_v1 }
 0x48c   :  { %1660 = vst [vmem:[#allocation8 + $0x38] sm:$0xff] %v1638_v43  }
 0x48d   :  { %1930 = shalt.err (!%p1927_p1)
}
 0x48e   :  { %1336 = dma.vmem_to_hbm [thread:$0]  %s1331_s7, 1024, %s3096_s4, [#allocation9], %s1976_s20, %s1976_s20, %s1977_s21  }
 0x48f   :  { %s1939_s10 = scalar_lea.vmem %s1343_s28, 1024  ;;  %p1944_p3 = scmp.lt.s32.totalorder %s1343_s28, %s1343_s28 }
 0x490   :  { %p1940_p2 = scmp.ne.s32.totalorder %s1343_s28, %s1939_s10  ;;  %p1945_p4 = scmp.lt.s32.totalorder %s1939_s10, %s1939_s10 }
 0x492   :  { %p1946_p5 = por %p1945_p4, %p1944_p3 }
 0x494   :  { %p1947_p6 = pnand %p1946_p5, %p1940_p2 }
 0x496   :  { %1950 = shalt.err (!%p1947_p6)
}
 0x497   :  { %1348 = dma.vmem_to_hbm [thread:$0]  %s1343_s28, 1024, %s3097_s5, [#allocation9], %s1976_s20, %s1976_s20, %s1977_s21  }
 0x498   :  { %1963 = dma.done.wait [#allocation4], 1024  }
 0x499   :  { %1964 = vsyncadd [#allocation4], 4294966272 }
 0x49a   :  { %1965 = dma.done.wait [#allocation9], 2048  }
 0x49b   :  { %1966 = vsyncadd [#allocation9], 4294965248 }
 0x49c   :  { %1967 = dma.done.wait [#allocation12], 2080  }
 0x49d   :  { %1968 = vsyncadd [#allocation12], 4294965216 }
 0x49e   :  { %1386 = vsyncpa [#allocation3], 1 }
 0x49f   :  { %1387 = vsyncpa [#allocation6], 1 }
 0x4a0   :  { %1388 = vsyncpa [#allocation4], 1 }
 0x4a1   :  { %1389 = vsyncpa [#allocation9], 1 }
 0x4a2   :  { %1390 = vsyncpa [#allocation12], 1 }

</bundles_post_ra>
